<compile_context>
chip_gen: v7x
topology: tpu7x:2x2x1
jax: 0.10.0
libtpu: 0.0.40
codegen_flags: <defaults>
</compile_context>

<pallas_src>
import functools

import jax
import jax.numpy as jnp
from jax.experimental import pallas as pl
from jax.experimental.pallas import tpu as pltpu


def _patch_embed_kernel(x_ref, o_ref, *, patch_size: int, patch_cols: int,
                        rows_per_step: int):
    """Relayout one block of patch rows.

    x_ref: (1, C, R*P, W) NCHW slab, W = L*P.
    o_ref: (1, R*L, C*P*P) lane-dense output block (hidden on lanes).
    """
    P = patch_size
    L = patch_cols
    R = rows_per_step
    C = x_ref.shape[1]

    # Relayout is done in f32 regardless of input dtype (VPU cast is free next to
    # the DMA; keeps the relayout on the well-supported 32-bit layout path).
    x = x_ref[0].astype(jnp.float32)          # (C, R*P, W)

    # Block-wide permutation factored into Mosaic-supported pieces:
    t = x.reshape(C, R, P, L, P)              # (C, R, Ph, L, Pw)   lane split
    t = jnp.swapaxes(t, -1, -2)               # (C, R, Ph, Pw, L)   batched minor swap
    t = t.reshape(C, R, P * P, L)             # (C, R, Ph*Pw, L)    contiguous merge
    t = jnp.swapaxes(t, -1, -2)               # (C, R, L, Ph*Pw)    batched minor swap

    # C static lane-contiguous writes fill the whole (R*L, hidden) block once;
    # the block is then written back to HBM as a single lane-dense DMA.
    for c in range(C):                        # C is tiny (3-4): bounded static loop
        o_ref[0, :, c * P * P:(c + 1) * P * P] = (
            t[c].reshape(R * L, P * P).astype(o_ref.dtype))


def _sublane_multiple(dtype) -> int:
    """Rows-per-tile alignment requirement for a dtype (8/16/32 for 4/2/1-byte)."""
    itemsize = jnp.dtype(dtype).itemsize
    return 8 * max(1, 4 // itemsize)


def _pick_rows_per_step(batch: int, patch_rows: int, patch_cols: int,
                        patch_size: int, c: int, w: int,
                        in_dtype, out_dtype,
                        target_bytes: int, vmem_cap_bytes: int) -> int:
    """Choose how many patch rows each grid step handles.

    Legal candidates r (divisors of patch_rows) must satisfy the (sublane, lane)
    tiling rule for both blocks -- dtype-aware -- or span the full dimension:
      input block  (1, C, r*P, W):        r*P  % sublane(in)  == 0
      output block (1, r*L, hidden):      r*L  % sublane(out) == 0
    and fit a VMEM budget (double-buffered blocks + lane-padded relayout temps).
    Among those, pick the smallest block moving >= target_bytes of input per
    step (else the largest fitting block), then step down if needed so the total
    grid has >= 2 steps (keeps both v7x TensorCores busy).
    """
    in_item = jnp.dtype(in_dtype).itemsize
    out_item = jnp.dtype(out_dtype).itemsize
    sub_in = _sublane_multiple(in_dtype)
    sub_out = _sublane_multiple(out_dtype)
    hidden = c * patch_size * patch_size

    def in_block_bytes(r):
        return r * patch_size * w * c * in_item

    def vmem_estimate(r):
        elems = r * patch_size * w * c
        in_b = elems * in_item
        out_b = r * patch_cols * hidden * out_item
        # Relayout temporaries materialize with the narrow (L-wide) lane dim
        # padded to 128 lanes: budget ~2 padded f32 copies of the block.
        pad = max(1, 128 // max(patch_cols, 1))
        tmp_b = 2 * elems * 4 * pad
        return 2 * (in_b + out_b) + tmp_b     # 2x: double-buffered pipeline

    candidates = []
    for r in range(1, patch_rows + 1):
        if patch_rows % r:
            continue
        in_ok = (r * patch_size) % sub_in == 0 or r == patch_rows
        out_ok = (r * patch_cols) % sub_out == 0 or r == patch_rows
        if in_ok and out_ok:
            candidates.append(r)

    fits = [r for r in candidates if vmem_estimate(r) <= vmem_cap_bytes]
    pool = fits if fits else candidates[:1]   # smallest aligned block as last resort

    choice = None
    for r in pool:
        if in_block_bytes(r) >= target_bytes:
            choice = r
            break
    if choice is None:
        choice = pool[-1]

    # Prefer >= 2 total grid steps so both v7x TensorCores get sharded work.
    if batch * (patch_rows // choice) < 2:
        smaller = [r for r in pool if batch * (patch_rows // r) >= 2]
        if smaller:
            choice = smaller[-1]
    return choice


def patch_embedding(x: jax.Array, patch_size: int,
                    rows_per_step: int | None = None,
                    out_dtype=jnp.float32,
                    target_bytes: int = 4 << 20,
                    vmem_cap_bytes: int = 24 << 20) -> jax.Array:
    """Pallas implementation of PatchEmbadding.forward.

    Args:
      x: (B, C, H, W) image batch (NCHW); any float dtype (cast happens in-kernel).
      patch_size: spatial patch size P (H == W, divisible by P).
      rows_per_step: optional override of patch rows per grid step (divides H/P).
      out_dtype: output dtype (float32 default for torch parity; bf16 halves
        output HBM traffic when acceptable downstream).
      target_bytes: desired input bytes per grid step (amortizes step overhead).
      vmem_cap_bytes: VMEM budget used when auto-picking the row block.

    Returns:
      (B, num_patches, C*P*P) patch embeddings in torch flatten order.
    """
    b, c, h, w = x.shape
    assert h == w and h % patch_size == 0, "square image divisible by patch_size"
    P = patch_size
    patch_rows = h // P
    patch_cols = w // P
    num_patches = patch_rows * patch_cols
    hidden_size = c * P * P

    if rows_per_step is None:
        rows_per_step = _pick_rows_per_step(
            b, patch_rows, patch_cols, P, c, w, x.dtype, out_dtype,
            target_bytes, vmem_cap_bytes)
    assert patch_rows % rows_per_step == 0
    num_row_steps = patch_rows // rows_per_step

    kernel = functools.partial(
        _patch_embed_kernel, patch_size=P, patch_cols=patch_cols,
        rows_per_step=rows_per_step)

    in_bytes = b * c * h * w * jnp.dtype(x.dtype).itemsize
    out_bytes = b * num_patches * hidden_size * jnp.dtype(out_dtype).itemsize

    return pl.pallas_call(
        kernel,
        out_shape=jax.ShapeDtypeStruct((b, num_patches, hidden_size), out_dtype),
        grid=(b, num_row_steps),
        in_specs=[
            # Full-width (lane-dense) slab of rows_per_step patch rows.
            pl.BlockSpec((1, c, rows_per_step * P, w),
                         lambda bi, ri: (bi, 0, ri, 0)),
        ],
        # Lane-dense output block: hidden_size on lanes, stored once per step.
        out_specs=pl.BlockSpec((1, rows_per_step * patch_cols, hidden_size),
                               lambda bi, ri: (bi, ri, 0)),
        compiler_params=pltpu.CompilerParams(
            # Both axes independent -> both v7x TensorCores can shard the work.
            dimension_semantics=("parallel", "parallel"),
            # Explicit scoped-VMEM limit: legal on every generation (<= 64 MiB
            # physical on v7x) and lifts v5e's 16 MiB scoped default.
            vmem_limit_bytes=32 << 20),
        cost_estimate=pl.CostEstimate(flops=0, transcendentals=0,
                                      bytes_accessed=in_bytes + out_bytes),
    )(x)


def _reference(x: jax.Array, patch_size: int, out_dtype=jnp.float32) -> jax.Array:
    b, c, h, w = x.shape
    n = h // patch_size
    x6 = x.reshape(b, c, n, patch_size, n, patch_size)
    x6 = x6.transpose(0, 2, 4, 1, 3, 5)  # (B, i, j, C, P, P)
    return x6.reshape(b, n * n, c * patch_size * patch_size).astype(out_dtype)


if __name__ == "__main__":
    # Small shapes consistent with the module's forward:
    # batch=2, channels=4, image_size=32, patch_size=8
    #   -> patch_len = 4, num_patches = 16, hidden_size = 4*8*8 = 256 (2 x 128 lanes)
    B, C, IMG, P = 2, 4, 32, 8
    key = jax.random.PRNGKey(0)
    x = jax.random.normal(key, (B, C, IMG, IMG), dtype=jnp.float32)
    ref = _reference(x, P)

    # Auto tiling (whole image per step at this tiny size).
    out = jax.block_until_ready(patch_embedding(x, P))
    assert out.shape == (B, (IMG // P) ** 2, C * P * P)
    assert out.dtype == jnp.float32
    assert jnp.allclose(out, ref), "mismatch vs reference (auto tiling)"

    # Row-tiled pipeline path (2 patch rows per grid step -> 2x2 grid).
    out2 = jax.block_until_ready(patch_embedding(x, P, rows_per_step=2))
    assert jnp.allclose(out2, ref), "mismatch vs reference (row tiled)"

    # bf16 input exercises the dtype-aware alignment heuristic (16-row tiles);
    # output stays float32 for torch parity and is bit-exact vs the reference.
    xb = x.astype(jnp.bfloat16)
    out3 = jax.block_until_ready(patch_embedding(xb, P))
    assert jnp.allclose(out3, _reference(xb, P)), "mismatch vs reference (bf16 in)"

    print("KERNEL_OK")
</pallas_src>

<mosaic_0001>
module attributes {stable_mosaic.version = 11 : i64} {
  func.func @_patch_embed_kernel(%arg0: i32, %arg1: i32, %arg2: memref<1x4x32x32xf32, #tpu.memory_space<vmem>>, %arg3: memref<1x16x256xf32, #tpu.memory_space<vmem>>) attributes {dimension_semantics = [#tpu.dimension_semantics<parallel>, #tpu.dimension_semantics<parallel>], iteration_bounds = array<i64: 2, 1>, scalar_prefetch = 0 : i64, scratch_operands = 0 : i64, tpu.core_type = #tpu.core_type<tc>, window_params = [{transform_indices = @transform_0, window_bounds = array<i64: 1, 4, 32, 32>}, {transform_indices = @transform_1, window_bounds = array<i64: 1, 16, 256>}]} {
    %c0 = arith.constant 0 : index
    %c0_0 = arith.constant 0 : index
    %c0_1 = arith.constant 0 : index
    %c0_2 = arith.constant 0 : index
    %0 = vector.load %arg2[%c0, %c0_0, %c0_1, %c0_2] : memref<1x4x32x32xf32, #tpu.memory_space<vmem>>, vector<1x4x32x32xf32>
    %1 = vector.shape_cast %0 : vector<1x4x32x32xf32> to vector<4x32x32xf32>
    %2 = vector.shape_cast %1 : vector<4x32x32xf32> to vector<4x4x8x4x8xf32>
    %3 = tpu.transpose %2, [0, 1, 2, 4, 3] : vector<4x4x8x4x8xf32> -> vector<4x4x8x8x4xf32>
    %4 = vector.shape_cast %3 : vector<4x4x8x8x4xf32> to vector<4x4x64x4xf32>
    %5 = tpu.transpose %4, [0, 1, 3, 2] : vector<4x4x64x4xf32> -> vector<4x4x4x64xf32>
    %6 = vector.extract_strided_slice %5 {offsets = [0, 0, 0, 0], sizes = [1, 4, 4, 64], strides = [1, 1, 1, 1]} : vector<4x4x4x64xf32> to vector<1x4x4x64xf32>
    %7 = vector.shape_cast %6 : vector<1x4x4x64xf32> to vector<4x4x64xf32>
    %8 = vector.shape_cast %7 : vector<4x4x64xf32> to vector<16x64xf32>
    %c0_3 = arith.constant 0 : index
    %c0_4 = arith.constant 0 : index
    %c0_5 = arith.constant 0 : index
    %9 = vector.load %arg3[%c0_3, %c0_4, %c0_5] : memref<1x16x256xf32, #tpu.memory_space<vmem>>, vector<1x16x64xf32>
    %10 = vector.shape_cast %9 : vector<1x16x64xf32> to vector<16x64xf32>
    %11 = vector.shape_cast %8 : vector<16x64xf32> to vector<1x16x64xf32>
    tpu.vector_store %arg3[%c0_3, %c0_4, %c0_5], %11 {strides = array<i32>} : memref<1x16x256xf32, #tpu.memory_space<vmem>>, vector<1x16x64xf32>,
    %12 = vector.extract_strided_slice %5 {offsets = [1, 0, 0, 0], sizes = [1, 4, 4, 64], strides = [1, 1, 1, 1]} : vector<4x4x4x64xf32> to vector<1x4x4x64xf32>
    %13 = vector.shape_cast %12 : vector<1x4x4x64xf32> to vector<4x4x64xf32>
    %14 = vector.shape_cast %13 : vector<4x4x64xf32> to vector<16x64xf32>
    %c0_6 = arith.constant 0 : index
    %c0_7 = arith.constant 0 : index
    %c64 = arith.constant 64 : index
    %15 = vector.load %arg3[%c0_6, %c0_7, %c64] : memref<1x16x256xf32, #tpu.memory_space<vmem>>, vector<1x16x64xf32>
    %16 = vector.shape_cast %15 : vector<1x16x64xf32> to vector<16x64xf32>
    %17 = vector.shape_cast %14 : vector<16x64xf32> to vector<1x16x64xf32>
    tpu.vector_store %arg3[%c0_6, %c0_7, %c64], %17 {strides = array<i32>} : memref<1x16x256xf32, #tpu.memory_space<vmem>>, vector<1x16x64xf32>,
    %18 = vector.extract_strided_slice %5 {offsets = [2, 0, 0, 0], sizes = [1, 4, 4, 64], strides = [1, 1, 1, 1]} : vector<4x4x4x64xf32> to vector<1x4x4x64xf32>
    %19 = vector.shape_cast %18 : vector<1x4x4x64xf32> to vector<4x4x64xf32>
    %20 = vector.shape_cast %19 : vector<4x4x64xf32> to vector<16x64xf32>
    %c0_8 = arith.constant 0 : index
    %c0_9 = arith.constant 0 : index
    %c128 = arith.constant 128 : index
    %21 = vector.load %arg3[%c0_8, %c0_9, %c128] : memref<1x16x256xf32, #tpu.memory_space<vmem>>, vector<1x16x64xf32>
    %22 = vector.shape_cast %21 : vector<1x16x64xf32> to vector<16x64xf32>
    %23 = vector.shape_cast %20 : vector<16x64xf32> to vector<1x16x64xf32>
    tpu.vector_store %arg3[%c0_8, %c0_9, %c128], %23 {strides = array<i32>} : memref<1x16x256xf32, #tpu.memory_space<vmem>>, vector<1x16x64xf32>,
    %24 = vector.extract_strided_slice %5 {offsets = [3, 0, 0, 0], sizes = [1, 4, 4, 64], strides = [1, 1, 1, 1]} : vector<4x4x4x64xf32> to vector<1x4x4x64xf32>
    %25 = vector.shape_cast %24 : vector<1x4x4x64xf32> to vector<4x4x64xf32>
    %26 = vector.shape_cast %25 : vector<4x4x64xf32> to vector<16x64xf32>
    %c0_10 = arith.constant 0 : index
    %c0_11 = arith.constant 0 : index
    %c192 = arith.constant 192 : index
    %27 = vector.load %arg3[%c0_10, %c0_11, %c192] : memref<1x16x256xf32, #tpu.memory_space<vmem>>, vector<1x16x64xf32>
    %28 = vector.shape_cast %27 : vector<1x16x64xf32> to vector<16x64xf32>
    %29 = vector.shape_cast %26 : vector<16x64xf32> to vector<1x16x64xf32>
    tpu.vector_store %arg3[%c0_10, %c0_11, %c192], %29 {strides = array<i32>} : memref<1x16x256xf32, #tpu.memory_space<vmem>>, vector<1x16x64xf32>,
    return
  }
  func.func @transform_0(%arg0: i32, %arg1: i32) -> (i32, i32, i32, i32) {
    %c0_i32 = arith.constant 0 : i32
    %c0_i32_0 = arith.constant 0 : i32
    %c0_i32_1 = arith.constant 0 : i32
    return %arg0, %c0_i32, %arg1, %c0_i32_0 : i32, i32, i32, i32
  }
  func.func @transform_1(%arg0: i32, %arg1: i32) -> (i32, i32, i32) {
    %c0_i32 = arith.constant 0 : i32
    %c0_i32_0 = arith.constant 0 : i32
    return %arg0, %arg1, %c0_i32 : i32, i32, i32
  }
}

</mosaic_0001>

<bundles_post_ra>
// kernel: tpu_custom_call.1
= control target key start
LH: loop header
LB: loop body
LE: loop exit
PB: predicated region body
PF: predicated region fallthrough
CT: control target
= control target key end

     0   :  { %6 = vsyncpa [#allocation3], 0  ;;  %s8133_s0 = inlined_call_operand.hbm [shape: f32[2,4,32,32], index: 0, kind: input, shape index: {}]   ;;  %s8134_s1 = inlined_call_operand.hbm [shape: f32[2,16,256], index: 1, kind: output, shape index: {}]  }
   0x1   :  { %8 = vsyncpa [#allocation3 + $0x1], 0 }
   0x2   :  { %9 = vsyncpa [#allocation4], 0 }
   0x3   :  { %11 = vsyncpa [#allocation4 + $0x1], 0  ;;  %s6408_s6 = smov 0   ;;  %s6410_s7 = smov 0  }
   0x4   :  { %s6412_s8 = smov 0   ;;  %s6414_s9 = smov 0  }
   0x5   :  { %s6416_s10 = smov 0   ;;  %s6418_s11 = smov 0  }
   0x6 LB: > { %s6181_s12 = sadd.s32 4294967295, %s6383_s11   ;;  %s6182_s13 = sadd.s32 4294967294, %s6383_s11   ;;  %s6383_s11 = sphi %s6418_s11, %s17_s11   ;;  %s6379_s10 = sphi %s6416_s10, %s8369_s10   ;;  %s6375_s9 = sphi %s6414_s9, %s8368_s9   ;;  %s6371_s8 = sphi %s6412_s8, %s8367_s8   ;;  %s6367_s7 = sphi %s6410_s7, %s8366_s7   ;;  %s6363_s6 = sphi %s6408_s6, %s8365_s6  }
   0x7   : > { %s29_s14 = sadd.s32 1, %s6379_s10  ;;  %s38_s15 = sadd.s32 1, %s6371_s8 }
   0x8   : > { %p31_p0 = scmp.ge.s32.totalorder %s29_s14, 2  ;;  %p45_p1 = scmp.ne.s32.totalorder %s6371_s8, %s6367_s7 }
   0x9   : > { %p46_p2 = scmp.eq.s32.totalorder %s6383_s11, 0  ;;  %p51_p3 = scmp.ne.s32.totalorder %s6367_s7, %s6363_s6 }
   0xa   : > { %s8371_s14 = smov (%p31_p0, %s29_s14), 0  ;;  %p52_p5 = scmp.eq.s32.totalorder %s6181_s12, 0 }
   0xb   : > { %p6449_p4 = por %p46_p2, %p45_p1  ;;  %s33_s17 = ssub.s32 %s6379_s10, %s8371_s14 }
   0xc   : > { %p77_p6 = scmp.eq.s32.totalorder %s6181_s12, 1  ;;  %p36_p7 = scmp.eq.s32.totalorder %s33_s17, 0 }
   0xd   : > { %p6455_p8 = por %p52_p5, %p51_p3  ;;  %p83_p10 = scmp.eq.s32.totalorder %s6182_s13, 1 }
   0xe   : > { %p6459_p9 = por %p77_p6, %p45_p1  ;;  %p6210_p13 = scmp.lt.s32.totalorder %s6383_s11, 2 }
   0xf   : > { %s6464_s20 = scalar_select %p36_p7, %s6371_s8, %s38_s15  }
  0x10   : > { %s8188_s19 = scalar_select %p6459_p9, 1, 0 }
  0x11   : > { %p6466_p11 = por %p83_p10, %p51_p3  ;;  %s103_s22 = sand.u32 1, %s6371_s8  }
  0x12   : > { %s6185_s23 = sshll.u32 %s103_s22, 7  ;;  %s6196_s24 = sshll.u32 %s6379_s10, 11 }
  0x13   : > { %s8189_s21 = scalar_select %p6466_p11, 1, 0 }
  0x14   : > { %s6477_s27 = scalar_lea.hbm %s8133_s0, %s6196_s24  ;;  %s107_s28 = scalar_lea.vmem [#allocation2], %s6185_s23 }
  0x15   : > { %s116_s29 = sshll.u32 %s107_s28, 4  ;;  %p6483_p0 = pnand %p6210_p13, %p6449_p4  ;;  %s6479_s29 = int_to_ptr.vmem [resolvable:$true] %s116_s29 }
  0x16   : > { %s6488_s2 = scalar_lea.sflag [#allocation3], %s103_s22  ;;  %s6271_s3 = scalar_lea.hbm %s6477_s27, 2048 }
  0x17   : > { %p6272_p2 = scmp.ne.s32.totalorder %s6477_s27, %s6271_s3  ;;  %p6273_p3 = pneg %p6483_p0 }
  0x18   : > { %s6276_s12 = scalar_lea.hbm %s8133_s0, 4096  ;;  %p6277_p4 = scmp.lt.u32.totalorder %s6477_s27, %s8133_s0 }
  0x19   : > { %p6274_p5 = pnand %p6273_p3, %p6272_p2  ;;  %p6278_p7 = scmp.lt.u32.totalorder %s6276_s12, %s6271_s3 }
  0x1a   : > { %p6280_p13 = scmp.lt.u32.totalorder %s6271_s3, %s6477_s27 }
  0x1b   : > { %p6275_p6 = pneg %p6274_p5  ;;  %p6279_p10 = por %p6278_p7, %p6277_p4 }
  0x1d   : > { %p6281_p12 = por %p6280_p13, %p6279_p10 }
  0x1f   : > { %p6282_p1 = pnand %p6281_p12, %p6275_p6 }
  0x21   : > { %6285 = shalt.err (!%p6282_p1)
}
  0x22   : > { %s6286_s16 = scalar_lea.vmem %s6479_s29, 2048  ;;  %s6385_s17 = smov [#allocation2]  }
  0x23   : > { %p6287_p2 = scmp.ne.s32.totalorder %s6479_s29, %s6286_s16  ;;  %s6291_s22 = sshll.u32 %s6385_s17, 4  ;;  %s6292_s22 = int_to_ptr.vmem [resolvable:$false] %s6291_s22 }
  0x24   : > { %s6293_s23 = scalar_lea.vmem %s6292_s22, 4096  ;;  %p6294_p9 = scmp.lt.s32.totalorder %s6479_s29, %s6292_s22 }
  0x25   : > { %p6289_p5 = pnand %p6287_p2, %p6273_p3  ;;  %p6295_p4 = scmp.lt.s32.totalorder %s6293_s23, %s6286_s16 }
  0x27   : > { %p6290_p11 = pneg %p6289_p5  ;;  %p6296_p7 = por %p6295_p4, %p6294_p9 }
  0x29   : > { %p6297_p10 = pnand %p6296_p7, %p6290_p11 }
  0x2b   : > { %6300 = shalt.err (!%p6297_p10)
}
  0x2c   : > { %s6386_s24 = smov 128   ;;  %s6387_s25 = smov 8  }
  0x2d   : > { %6205 = dma.hbm_to_vmem [thread:$0]  (!%p6483_p0), %s6477_s27, 2048, %s6479_s29, %s6488_s2, %s6386_s24, %s6386_s24, %s6387_s25  }
  0x2e   : > { %p124_p12 = scmp.lt.s32.totalorder %s6383_s11, 3  ;;  %p8191_p1 = scmp.ge.s32.totalorder %s6383_s11, 1 }
  0x30   : > { %p125_p3 = pnand %p8191_p1, %p124_p12 }
  0x32   : > { %128 = sbr.rel (%p125_p3) target bundleno = 1003 (0x3eb), region = 24 }
  0x39   : > { %s6520_s26 = sand.u32 1, %s6367_s7  }
  0x3a   : > { %s6189_s28 = sshll.u32 %s6520_s26, 7  ;;  %s131_s3 = scalar_lea.sflag [#allocation3], %s6520_s26 }
  0x3b   : > { %s6524_s4 = scalar_lea.vmem [#allocation2], %s6189_s28 }
  0x3c   : > { %6354 = dma.done.wait (%p6455_p8), %s131_s3, 2048  }
  0x3d   : > { %6356 = vsyncadd (%p6455_p8), %s131_s3, 4294965248  ;;  %v6531_v0 = vld [vmem:[%s6524_s4 + $0x10] sm:$0xff]  ;;  %v6534_v1 = vld [vmem:[%s6524_s4] sm:$0xff]  ;;  %s6388_s27 = smov 120   ;;  %s6389_s18 = smov 112   ;;  %v336_v40 = vlaneseq  ;;  %vm6035_vm0 = vcmask 523264  }
  0x3e   : > { %191 = vrot.lane.b32.xlu1 %v6531_v0, %s6388_s27  ;;  %187 = vrot.lane.b32.xlu0 %v6534_v1, %s6388_s27  ;;  %v6539_v2 = vld [vmem:[%s6524_s4 + $0x18] sm:$0xff]  ;;  %v6542_v3 = vld [vmem:[%s6524_s4 + $0x8] sm:$0xff]  ;;  %s6390_s29 = smov 104   ;;  %v6391_v38 = vmov 1983009808   ;;  %s6190_s30 = sshll.u32 %s6520_s26, 5 }
  0x3f   : > { %v6547_v4 = vld [vmem:[%s6524_s4 + $0x28] sm:$0xff]  ;;  %v6550_v5 = vld [vmem:[%s6524_s4 + $0x20] sm:$0xff]  ;;  %v6555_v6 = vld [vmem:[%s6524_s4 + $0x38] sm:$0xff]  ;;  %v334_v39 = vunpack.c.l.s4 %v6391_v38  ;;  %v6392_v43 = vmov 1934713408   ;;  %v337_v46 = vshrl.u32 %v336_v40, 7 }
  0x40   : > { %v6558_v7 = vld [vmem:[%s6524_s4 + $0x30] sm:$0xff]  ;;  %v6563_v8 = vld [vmem:[%s6524_s4 + $0x48] sm:$0xff]  ;;  %v6566_v9 = vld [vmem:[%s6524_s4 + $0x40] sm:$0xff]  ;;  %v366_v44 = vunpack.c.l.s4 %v6392_v43  ;;  %s8003_s2 = scalar_lea.vmem [#allocation5], %s6190_s30  ;;  %s6394_s5 = smov 64   ;;  %vm6050_vm1 = vcmask 1048064  }
  0x41   : > { %v6571_v10 = vld [vmem:[%s6524_s4 + $0x58] sm:$0xff]  ;;  %v6574_v11 = vld [vmem:[%s6524_s4 + $0x50] sm:$0xff]  ;;  %v6579_v12 = vld [vmem:[%s6524_s4 + $0x68] sm:$0xff]  ;;  %v335_v45 = vunpack.c.0.s8 %v334_v39  ;;  %s6197_s12 = sshll.u32 %s6375_s9, 9  ;;  %s6094_s13 = sshll.u32 %s8003_s2, 4  ;;  %s8083_s13 = int_to_ptr.vmem [resolvable:$true] %s6094_s13 }
  0x42   : > { %193 = vrot.lane.b32.xlu1 %v6539_v2, %s6388_s27  ;;  %189 = vrot.lane.b32.xlu0 %v6542_v3, %s6388_s27  ;;  %v6582_v13 = vld [vmem:[%s6524_s4 + $0x60] sm:$0xff]  ;;  %v6587_v14 = vld [vmem:[%s6524_s4 + $0x78] sm:$0xff]  ;;  %v367_v49 = vunpack.c.0.s8 %v366_v44  ;;  %s8081_s17 = scalar_lea.hbm %s8134_s1, %s6197_s12  ;;  %s6078_s22 = scalar_lea.sflag [#allocation4], %s6520_s26 }
  0x43   : > { %v6590_v15 = vld [vmem:[%s6524_s4 + $0x70] sm:$0xff]  ;;  %v6659_v51 = vsub.s32 %v335_v45, %v337_v46  ;;  %s6301_s23 = scalar_lea.vmem %s8083_s13, 512  ;;  %p8362_p9 = scmp.ne.s32.totalorder %s8188_s19, 0 }
  0x44   : > { %v6666_v59 = vsub.s32 %v367_v49, %v337_v46  ;;  %p6302_p8 = scmp.ne.s32.totalorder %s8083_s13, %s6301_s23  ;;  %s6395_s9 = smov [#allocation5]  }
  0x45   : > { %s6305_s24 = sshll.u32 %s6395_s9, 4  ;;  %s6306_s24 = int_to_ptr.vmem [resolvable:$false] %s6305_s24 }
  0x46   : > { %197 = vrot.lane.b32.xlu1 %v6547_v4, %s6388_s27  ;;  %195 = vrot.lane.b32.xlu0 %v6550_v5, %s6388_s27  ;;  %p6303_p11 = pnand %p6302_p8, %p8362_p9  ;;  %s6307_s25 = scalar_lea.vmem %s6306_s24, 1024 }
  0x47   : > { %p6308_p6 = scmp.lt.s32.totalorder %s8083_s13, %s6306_s24  ;;  %p6309_p13 = scmp.lt.s32.totalorder %s6307_s25, %s6301_s23 }
  0x48   : > { %p6304_p0 = pneg %p6303_p11 }
  0x49   : > { %p6310_p2 = por %p6309_p13, %p6308_p6 }
  0x4a   : > { %201 = vrot.lane.b32.xlu1 %v6555_v6, %s6388_s27  ;;  %199 = vrot.lane.b32.xlu0 %v6558_v7, %s6388_s27 }
  0x4b   : > { %p6311_p5 = pnand %p6310_p2, %p6304_p0 }
  0x4e   : > { %205 = vrot.lane.b32.xlu1 %v6563_v8, %s6388_s27  ;;  %203 = vrot.lane.b32.xlu0 %v6566_v9, %s6388_s27 }
  0x52   : > { %209 = vrot.lane.b32.xlu1 %v6571_v10, %s6388_s27  ;;  %207 = vrot.lane.b32.xlu0 %v6574_v11, %s6388_s27 }
  0x56   : > { %213 = vrot.lane.b32.xlu1 %v6579_v12, %s6388_s27  ;;  %211 = vrot.lane.b32.xlu0 %v6582_v13, %s6388_s27 }
  0x5a   : > { %217 = vrot.lane.b32.xlu1 %v6587_v14, %s6388_s27  ;;  %215 = vrot.lane.b32.xlu0 %v6590_v15, %s6388_s27 }
  0x5e   : > { %237 = vrot.lane.b32.xlu1 %v6542_v3, %s6389_s18  ;;  %235 = vrot.lane.b32.xlu0 %v6534_v1, %s6389_s18 }
  0x62   : > { %241 = vrot.lane.b32.xlu1 %v6539_v2, %s6389_s18  ;;  %239 = vrot.lane.b32.xlu0 %v6531_v0, %s6389_s18 }
  0x66   : > { %245 = vrot.lane.b32.xlu1 %v6547_v4, %s6389_s18  ;;  %243 = vrot.lane.b32.xlu0 %v6550_v5, %s6389_s18 }
  0x6a   : > { %249 = vrot.lane.b32.xlu1 %v6555_v6, %s6389_s18  ;;  %247 = vrot.lane.b32.xlu0 %v6558_v7, %s6389_s18 }
  0x6e   : > { %253 = vrot.lane.b32.xlu1 %v6563_v8, %s6389_s18  ;;  %251 = vrot.lane.b32.xlu0 %v6566_v9, %s6389_s18 }
  0x72   : > { %257 = vrot.lane.b32.xlu1 %v6571_v10, %s6389_s18  ;;  %255 = vrot.lane.b32.xlu0 %v6574_v11, %s6389_s18 }
  0x76   : > { %261 = vrot.lane.b32.xlu1 %v6579_v12, %s6389_s18  ;;  %259 = vrot.lane.b32.xlu0 %v6582_v13, %s6389_s18 }
  0x7a   : > { %265 = vrot.lane.b32.xlu1 %v6587_v14, %s6389_s18  ;;  %263 = vrot.lane.b32.xlu0 %v6590_v15, %s6389_s18 }
  0x7e   : > { %285 = vrot.lane.b32.xlu1 %v6542_v3, %s6390_s29  ;;  %283 = vrot.lane.b32.xlu0 %v6534_v1, %s6390_s29 }
  0x82   : > { %289 = vrot.lane.b32.xlu1 %v6539_v2, %s6390_s29  ;;  %287 = vrot.lane.b32.xlu0 %v6531_v0, %s6390_s29 }
  0x86   : > { %293 = vrot.lane.b32.xlu1 %v6547_v4, %s6390_s29  ;;  %291 = vrot.lane.b32.xlu0 %v6550_v5, %s6390_s29 }
  0x8a   : > { %297 = vrot.lane.b32.xlu1 %v6555_v6, %s6390_s29  ;;  %295 = vrot.lane.b32.xlu0 %v6558_v7, %s6390_s29 }
  0x8e   : > { %301 = vrot.lane.b32.xlu1 %v6563_v8, %s6390_s29  ;;  %299 = vrot.lane.b32.xlu0 %v6566_v9, %s6390_s29 }
  0x92   : > { %305 = vrot.lane.b32.xlu1 %v6571_v10, %s6390_s29  ;;  %303 = vrot.lane.b32.xlu0 %v6574_v11, %s6390_s29 }
  0x96   : > { %309 = vrot.lane.b32.xlu1 %v6579_v12, %s6390_s29  ;;  %307 = vrot.lane.b32.xlu0 %v6582_v13, %s6390_s29 }
  0x9a   : > { %313 = vrot.lane.b32.xlu1 %v6587_v14, %s6390_s29  ;;  %311 = vrot.lane.b32.xlu0 %v6590_v15, %s6390_s29 }
  0xb0   : > { %v6626_v16 = vpop.permute.xlu1 %191  ;;  %v6628_v17 = vpop.permute.xlu0 %187 }
  0xb4   : > { %v6630_v18 = vpop.permute.xlu1 %193  ;;  %v6632_v19 = vpop.permute.xlu0 %189 }
  0xb8   : > { %v6634_v20 = vpop.permute.xlu1 %197  ;;  %v6636_v21 = vpop.permute.xlu0 %195 }
  0xbc   : > { %v6638_v22 = vpop.permute.xlu1 %201  ;;  %v6640_v23 = vpop.permute.xlu0 %199 }
  0xc0   : > { %v6642_v24 = vpop.permute.xlu1 %205  ;;  %v6644_v25 = vpop.permute.xlu0 %203 }
  0xc4   : > { %v6646_v26 = vpop.permute.xlu1 %209  ;;  %v6648_v27 = vpop.permute.xlu0 %207 }
  0xc8   : > { %v6650_v28 = vpop.permute.xlu1 %213  ;;  %v6652_v29 = vpop.permute.xlu0 %211 }
  0xcc   : > { %v6654_v30 = vpop.permute.xlu1 %217  ;;  %v6656_v31 = vpop.permute.xlu0 %215 }
  0xd0   : > { %v238_v32 = vpop.permute.xlu1 %237  ;;  %v236_v33 = vpop.permute.xlu0 %235 }
  0xd1   : > { %v399_v50 = vcombine.low %v6542_v3, %v238_v32  ;;  %v400_v52 = vcombine.high %v6542_v3, %v238_v32  ;;  %v331_v53 = vcombine.low %v6534_v1, %v236_v33  ;;  %v332_v54 = vcombine.high %v6534_v1, %v236_v33 }
  0xd3   : > { %v6669_v60 = vrot.slane %v399_v50, %v6659_v51  ;;  %v6674_v63 = vrot.slane %v400_v52, %v6659_v51  ;;  %v6680_v32 = vrot.slane %v332_v54, %v6659_v51 }
  0xd4   : > { %v242_v34 = vpop.permute.xlu1 %241  ;;  %v240_v35 = vpop.permute.xlu0 %239 }
  0xd5   : > { %v535_v55 = vcombine.low %v6539_v2, %v242_v34  ;;  %v536_v56 = vcombine.high %v6539_v2, %v242_v34  ;;  %v467_v61 = vcombine.low %v6531_v0, %v240_v35  ;;  %v468_v62 = vcombine.high %v6531_v0, %v240_v35 }
  0xd6   : > { %v6689_v0 = vrot.slane %v331_v53, %v6659_v51 }
  0xd7   : > { %v6683_v33 = vrot.slane %v535_v55, %v6659_v51  ;;  %v6686_v34 = vrot.slane %v536_v56, %v6659_v51  ;;  %v6696_v43 = vrot.slane %v467_v61, %v6659_v51  ;;  %v6699_v44 = vrot.slane %v468_v62, %v6659_v51 }
  0xd8   : > { %v246_v36 = vpop.permute.xlu1 %245  ;;  %v244_v37 = vpop.permute.xlu0 %243 }
  0xd9   : > { %v671_v1 = vcombine.low %v6547_v4, %v246_v36  ;;  %v672_v3 = vcombine.high %v6547_v4, %v246_v36  ;;  %v603_v2 = vcombine.low %v6550_v5, %v244_v37  ;;  %v604_v35 = vcombine.high %v6550_v5, %v244_v37 }
  0xdb   : > { %v6704_v5 = vrot.slane %v671_v1, %v6659_v51  ;;  %v6707_v37 = vrot.slane %v672_v3, %v6659_v51 }
  0xdc   : > { %v250_v41 = vpop.permute.xlu1 %249  ;;  %v248_v42 = vpop.permute.xlu0 %247 }
  0xdd   : > { %v807_v38 = vcombine.low %v6555_v6, %v250_v41  ;;  %v808_v4 = vcombine.high %v6555_v6, %v250_v41  ;;  %v739_v36 = vcombine.low %v6558_v7, %v248_v42  ;;  %v740_v45 = vcombine.high %v6558_v7, %v248_v42  ;;  %8192 = vst [vmem:[#allocation8_spill] sm:$0xff] %v6704_v5 }
  0xde   : > { %8193 = vst [vmem:[#allocation9_spill] sm:$0xff] %v6707_v37  ;;  %v6710_v6 = vrot.slane %v603_v2, %v6659_v51  ;;  %v6718_v42 = vrot.slane %v604_v35, %v6659_v51 }
  0xdf   : > { %v6721_v53 = vrot.slane %v807_v38, %v6659_v51  ;;  %v6724_v54 = vrot.slane %v808_v4, %v6659_v51  ;;  %v6727_v55 = vrot.slane %v739_v36, %v6659_v51 }
  0xe0   : > { %v254_v47 = vpop.permute.xlu1 %253  ;;  %v252_v48 = vpop.permute.xlu0 %251  ;;  %8194 = vst [vmem:[#allocation10_spill] sm:$0xff] %v6710_v6  ;;  %8195 = vst [vmem:[#allocation11_spill] sm:$0xff] %v6718_v42 }
  0xe1   : > { %v943_v46 = vcombine.low %v6563_v8, %v254_v47  ;;  %v944_v41 = vcombine.high %v6563_v8, %v254_v47  ;;  %v875_v49 = vcombine.low %v6566_v9, %v252_v48  ;;  %v876_v50 = vcombine.high %v6566_v9, %v252_v48  ;;  %8196 = vst [vmem:[#allocation12_spill] sm:$0xff] %v6727_v55 }
  0xe2   : > { %v6730_v9 = vrot.slane %v740_v45, %v6659_v51 }
  0xe3   : > { %v6733_v48 = vrot.slane %v943_v46, %v6659_v51  ;;  %v6744_v3 = vrot.slane %v875_v49, %v6659_v51  ;;  %v6747_v2 = vrot.slane %v876_v50, %v6659_v51 }
  0xe4   : > { %v258_v57 = vpop.permute.xlu1 %257  ;;  %v256_v58 = vpop.permute.xlu0 %255 }
  0xe5   : > { %v1079_v52 = vcombine.low %v6571_v10, %v258_v57  ;;  %v1080_v7 = vcombine.high %v6571_v10, %v258_v57  ;;  %v1011_v10 = vcombine.low %v6574_v11, %v256_v58  ;;  %v1012_v56 = vcombine.high %v6574_v11, %v256_v58 }
  0xe6   : > { %v6738_v57 = vrot.slane %v944_v41, %v6659_v51 }
  0xe7   : > { %v6750_v35 = vrot.slane %v1079_v52, %v6659_v51  ;;  %v6753_v11 = vrot.slane %v1080_v7, %v6659_v51  ;;  %v6760_v45 = vrot.slane %v1011_v10, %v6659_v51  ;;  %v6763_v46 = vrot.slane %v1012_v56, %v6659_v51 }
  0xe8   : > { %v262_v39 = vpop.permute.xlu1 %261  ;;  %v260_v40 = vpop.permute.xlu0 %259 }
  0xe9   : > { %v1215_v61 = vcombine.low %v6579_v12, %v262_v39  ;;  %v1216_v62 = vcombine.high %v6579_v12, %v262_v39  ;;  %v1147_v1 = vcombine.low %v6582_v13, %v260_v40  ;;  %v1148_v58 = vcombine.high %v6582_v13, %v260_v40 }
  0xeb   : > { %v6768_v13 = vrot.slane %v1215_v61, %v6659_v51  ;;  %v6771_v40 = vrot.slane %v1216_v62, %v6659_v51 }
  0xec   : > { %v266_v8 = vpop.permute.xlu1 %265  ;;  %v264_v47 = vpop.permute.xlu0 %263 }
  0xed   : > { %v1351_v38 = vcombine.low %v6587_v14, %v266_v8  ;;  %v1352_v12 = vcombine.high %v6587_v14, %v266_v8  ;;  %v1283_v4 = vcombine.low %v6590_v15, %v264_v47  ;;  %v6774_v14 = vrot.slane %v1147_v1, %v6659_v51 }
  0xee   : > { %v1284_v50 = vcombine.high %v6590_v15, %v264_v47 }
  0xef   : > { %v6785_v56 = vrot.slane %v1351_v38, %v6659_v51  ;;  %v6788_v61 = vrot.slane %v1352_v12, %v6659_v51  ;;  %v6791_v62 = vrot.slane %v1283_v4, %v6659_v51 }
  0xf0   : > { %v286_v36 = vpop.permute.xlu1 %285  ;;  %v284_v39 = vpop.permute.xlu0 %283  ;;  %v6802_v4 = vrot.slane %v1284_v50, %v6659_v51 }
  0xf1   : > { %v347_v41 = vcombine.low %v6628_v17, %v284_v39  ;;  %v348_v49 = vcombine.high %v6628_v17, %v284_v39  ;;  %v415_v52 = vcombine.low %v6632_v19, %v286_v36  ;;  %v416_v7 = vcombine.high %v6632_v19, %v286_v36 }
  0xf2   : > { %v6782_v17 = vrot.slane %v1148_v58, %v6659_v51  ;;  %8197 = vst [vmem:[#allocation13_spill] sm:$0xff] %v6802_v4 }
  0xf3   : > { %v362_v8 = vrot.slane %v348_v49, %v6659_v51  ;;  %v355_v10 = vrot.slane %v347_v41, %v6659_v51  ;;  %v423_v49 = vrot.slane %v415_v52, %v6659_v51  ;;  %v430_v55 = vrot.slane %v416_v7, %v6659_v51 }
  0xf4   : > { %v290_v15 = vpop.permute.xlu1 %289  ;;  %v288_v47 = vpop.permute.xlu0 %287 }
  0xf5   : > { %v551_v19 = vcombine.low %v6630_v18, %v290_v15  ;;  %v552_v1 = vcombine.high %v6630_v18, %v290_v15  ;;  %v483_v36 = vcombine.low %v6626_v16, %v288_v47  ;;  %v484_v58 = vcombine.high %v6626_v16, %v288_v47 }
  0xf6   : > { %v363_v39 = vcombine.low %v6689_v0, %v355_v10  ;;  %v364_v38 = vcombine.high %v6689_v0, %v355_v10  ;;  %v379_v12 = vcombine.low %v6680_v32, %v362_v8  ;;  %v380_v41 = vcombine.high %v6680_v32, %v362_v8 }
  0xf7   : > { %v6807_v18 = vrot.slane %v551_v19, %v6659_v51  ;;  %v6818_v50 = vrot.slane %v552_v1, %v6659_v51  ;;  %v6821_v52 = vrot.slane %v483_v36, %v6659_v51  ;;  %v6824_v7 = vrot.slane %v484_v58, %v6659_v51 }
  0xf8   : > { %v294_v15 = vpop.permute.xlu1 %293  ;;  %v292_v16 = vpop.permute.xlu0 %291  ;;  %v371_v47 = vrot.slane %v363_v39, %v6666_v59  ;;  %v378_v0 = vrot.slane %v364_v38, %v6666_v59  ;;  %v6812_v10 = vrot.slane %v379_v12, %v6666_v59  ;;  %v6815_v32 = vrot.slane %v380_v41, %v6666_v59 }
  0xf9   : > { %v687_v8 = vcombine.low %v6634_v20, %v294_v15  ;;  %v688_v19 = vcombine.high %v6634_v20, %v294_v15  ;;  %v619_v39 = vcombine.low %v6636_v21, %v292_v16  ;;  %v620_v38 = vcombine.high %v6636_v21, %v292_v16 }
  0xfa   : > { %1419 = vxpose.xlu0.b32.start.end [1/1] (short) (narrow) %v371_v47, 8  ;;  %v8142_v12 = vmov 0.0   ;;  %v431_v21 = vcombine.low %v6669_v60, %v423_v49  ;;  %v432_v16 = vcombine.high %v6669_v60, %v423_v49 }
  0xfb   : > { %v395_v41 = vcombine.high %v371_v47, %v8142_v12  ;;  %v6832_v1 = vrot.slane %v687_v8, %v6659_v51  ;;  %v397_v36 = vcombine.high %v6812_v10, %v8142_v12  ;;  %v396_v58 = vcombine.high %v378_v0, %v8142_v12 }
  0xfc   : > { %v398_v37 = vcombine.high %v6815_v32, %v8142_v12  ;;  %v298_v20 = vpop.permute.xlu1 %297  ;;  %v296_v15 = vpop.permute.xlu0 %295  ;;  %v447_v47 = vcombine.low %v6674_v63, %v430_v55  ;;  %v448_v8 = vcombine.high %v6674_v63, %v430_v55  ;;  %v6851_v12 = vrot.slane %v432_v16, %v6666_v59 }
  0xfd   : > { %8198 = vst [vmem:[#allocation14_spill] sm:$0xff] %v6832_v1  ;;  %1451 = vxpose.xlu1.b32.start.end [1/1] (short) (narrow) %v395_v41, 8  ;;  %v823_v5 = vcombine.low %v6638_v22, %v298_v20  ;;  %v824_v1 = vcombine.high %v6638_v22, %v298_v20  ;;  %v755_v4 = vcombine.low %v6640_v23, %v296_v15 }
  0xfe   : > { %v756_v42 = vcombine.high %v6640_v23, %v296_v15  ;;  %1483 = vxpose.xlu0.b32.start.end [1/1] (short) (narrow) %v378_v0, 8  ;;  %v6848_v41 = vrot.slane %v431_v21, %v6666_v59  ;;  %v6854_v60 = vrot.slane %v447_v47, %v6666_v59  ;;  %v6857_v63 = vrot.slane %v448_v8, %v6666_v59 }
  0xff   : > { %v6860_v55 = vrot.slane %v688_v19, %v6659_v51  ;;  %v6863_v22 = vrot.slane %v823_v5, %v6659_v51  ;;  %v6866_v23 = vrot.slane %v824_v1, %v6659_v51  ;;  %v6872_v0 = vrot.slane %v619_v39, %v6659_v51 }
 0x100   : > { %8199 = vst [vmem:[#allocation15_spill] sm:$0xff] %v6857_v63  ;;  %v6869_v49 = vrot.slane %v756_v42, %v6659_v51  ;;  %v6875_v20 = vrot.slane %v620_v38, %v6659_v51  ;;  %v6878_v15 = vrot.slane %v755_v4, %v6659_v51  ;;  %v302_v19 = vpop.permute.xlu1 %301  ;;  %v300_v21 = vpop.permute.xlu0 %299  ;;  %v8204_v5 = vmov 0.0  }
 0x101   : > { %8200 = vst [vmem:[#allocation16_spill] sm:$0xff] %v6860_v55  ;;  %8201 = vst [vmem:[#allocation17_spill] sm:$0xff] %v6863_v22  ;;  %1579 = vxpose.xlu1.b32.start.end [1/1] (short) (narrow) %v397_v36, 8  ;;  %v463_v16 = vcombine.high %v6848_v41, %v8204_v5  ;;  %v464_v42 = vcombine.high %v6851_v12, %v8204_v5  ;;  %v6888_v39 = vcombine.high %v6854_v60, %v8204_v5 }
 0x102   : > { %8202 = vst [vmem:[#allocation18_spill] sm:$0xff] %v6872_v0  ;;  %8203 = vst [vmem:[#allocation19_spill] sm:$0xff] %v6878_v15  ;;  %v6892_v4 = vcombine.high %v6857_v63, %v8204_v5  ;;  %v959_v47 = vcombine.low %v6642_v24, %v302_v19  ;;  %v960_v8 = vcombine.high %v6642_v24, %v302_v19  ;;  %1515 = vxpose.xlu0.b32.start.end [1/1] (short) (narrow) %v396_v58, 8 }
 0x103   : > { %v891_v55 = vcombine.low %v6644_v25, %v300_v21  ;;  %v892_v63 = vcombine.high %v6644_v25, %v300_v21  ;;  %v499_v19 = vcombine.low %v6696_v43, %v6821_v52  ;;  %v515_v38 = vcombine.low %v6699_v44, %v6824_v7 }
 0x104   : > { %v6909_v36 = vrot.slane %v959_v47, %v6659_v51  ;;  %v6912_v22 = vrot.slane %v960_v8, %v6659_v51  ;;  %v306_v24 = vpop.permute.xlu1 %305  ;;  %v304_v58 = vpop.permute.xlu0 %303  ;;  %v500_v47 = vcombine.high %v6696_v43, %v6821_v52 }
 0x105   : > { %1643 = vxpose.xlu1.b32.start.end [1/1] (short) (narrow) %v398_v37, 8  ;;  %v6917_v1 = vrot.slane %v891_v55, %v6659_v51  ;;  %v1095_v25 = vcombine.low %v6646_v26, %v306_v24  ;;  %v1096_v21 = vcombine.high %v6646_v26, %v306_v24  ;;  %v6926_v37 = vrot.slane %v892_v63, %v6659_v51 }
 0x106   : > { %1547 = vxpose.xlu0.b32.start.end [1/1] (short) (narrow) %v6812_v10, 8  ;;  %v516_v55 = vcombine.high %v6699_v44, %v6824_v7  ;;  %v1027_v44 = vcombine.low %v6648_v27, %v304_v58  ;;  %v1028_v7 = vcombine.high %v6648_v27, %v304_v58 }
 0x107   : > { %v6942_v10 = vrot.slane %v1095_v25, %v6659_v51  ;;  %v6945_v24 = vrot.slane %v1096_v21, %v6659_v51  ;;  %v8213_v21 = vld [vmem:[#allocation14_spill] sm:$0xff] }
 0x108   : > { %v310_v26 = vpop.permute.xlu1 %309  ;;  %v308_v8 = vpop.permute.xlu0 %307  ;;  %v6966_v58 = vrot.slane %v1028_v7, %v6659_v51 }
 0x109   : > { %1707 = vxpose.xlu1.b32.start.end [1/1] (short) (narrow) %v463_v16, 8  ;;  %v1231_v43 = vcombine.low %v6650_v28, %v310_v26  ;;  %v1232_v52 = vcombine.high %v6650_v28, %v310_v26  ;;  %v1163_v15 = vcombine.low %v6652_v29, %v308_v8  ;;  %v1164_v63 = vcombine.high %v6652_v29, %v308_v8 }
 0x10a   : > { %1611 = vxpose.xlu0.b32.start.end [1/1] (short) (narrow) %v6815_v32, 8  ;;  %v6963_v28 = vrot.slane %v1027_v44, %v6659_v51  ;;  %v6989_v26 = vrot.slane %v499_v19, %v6666_v59  ;;  %v6992_v16 = vrot.slane %v500_v47, %v6666_v59  ;;  %v7021_v32 = vrot.slane %v515_v38, %v6666_v59  ;;  %v8214_v47 = vld [vmem:[#allocation8_spill] sm:$0xff] }
 0x10b   : > { %v6969_v29 = vrot.slane %v1231_v43, %v6659_v51  ;;  %v6972_v8 = vrot.slane %v1232_v52, %v6659_v51  ;;  %v6981_v44 = vrot.slane %v1164_v63, %v6659_v51  ;;  %v6986_v7 = vrot.slane %v1163_v15, %v6659_v51 }
 0x10c   : > { %v314_v52 = vpop.permute.xlu1 %313  ;;  %v312_v27 = vpop.permute.xlu0 %311  ;;  %v531_v38 = vcombine.high %v6989_v26, %v8204_v5 }
 0x10d   : > { %1771 = vxpose.xlu1.b32.start.end [1/1] (short) (narrow) %v464_v42, 8  ;;  %v1367_v43 = vcombine.low %v6654_v30, %v314_v52  ;;  %v1368_v63 = vcombine.high %v6654_v30, %v314_v52  ;;  %v1299_v15 = vcombine.low %v6656_v31, %v312_v27  ;;  %v7024_v42 = vrot.slane %v516_v55, %v6666_v59 }
 0x10e   : > { %1675 = vxpose.xlu0.b32.start.end [1/1] (short) (narrow) %v6848_v41, 8  ;;  %v1300_v41 = vcombine.high %v6656_v31, %v312_v27  ;;  %v532_v55 = vcombine.high %v6992_v16, %v8204_v5  ;;  %v567_v27 = vcombine.low %v6683_v33, %v6807_v18  ;;  %v583_v30 = vcombine.low %v6686_v34, %v6818_v50 }
 0x10f   : > { %v7029_v52 = vrot.slane %v1367_v43, %v6659_v51  ;;  %v7032_v31 = vrot.slane %v1368_v63, %v6659_v51  ;;  %v568_v43 = vcombine.high %v6683_v33, %v6807_v18  ;;  %v7056_v19 = vcombine.high %v7024_v42, %v8204_v5 }
 0x110   : > { %v584_v33 = vcombine.high %v6686_v34, %v6818_v50  ;;  %v636_v63 = vcombine.high %v6710_v6, %v6872_v0  ;;  %v7090_v34 = vrot.slane %v583_v30, %v6666_v59  ;;  %v703_v0 = vcombine.low %v8214_v47, %v8213_v21 }
 0x111   : > { %1835 = vxpose.xlu1.b32.start.end [1/1] (short) (narrow) %v6888_v39, 8  ;;  %v7035_v39 = vrot.slane %v1299_v15, %v6659_v51  ;;  %v7049_v15 = vrot.slane %v1300_v41, %v6659_v51  ;;  %v7071_v41 = vrot.slane %v568_v43, %v6666_v59  ;;  %v8206_v43 = vld [vmem:[#allocation13_spill] sm:$0xff] }
 0x112   : > { %1739 = vxpose.xlu0.b32.start.end [1/1] (short) (narrow) %v6851_v12, 8  ;;  %v533_v12 = vcombine.high %v7021_v32, %v8204_v5  ;;  %v7099_v25 = vrot.slane %v636_v63, %v6666_v59  ;;  %v7113_v50 = vrot.slane %v584_v33, %v6666_v59  ;;  %v704_v63 = vcombine.high %v8214_v47, %v8213_v21  ;;  %v8218_v47 = vld [vmem:[#allocation16_spill] sm:$0xff] }
 0x113   : > { %v7110_v30 = vcombine.high %v7071_v41, %v8204_v5  ;;  %v7136_v6 = vrot.slane %v703_v0, %v6666_v59  ;;  %v8222_v0 = vcombine.low %v6730_v9, %v6869_v49 }
 0x114   : > { %8208 = vst [vmem:[#allocation13_spill] sm:$0xff] %v7099_v25  ;;  %v7139_v21 = vrot.slane %v704_v63, %v6666_v59  ;;  %v8224_v63 = vcombine.high %v6730_v9, %v6869_v49 }
 0x115   : > { %1899 = vxpose.xlu1.b32.start.end [1/1] (short) (narrow) %v6892_v4, 8  ;;  %v7068_v4 = vrot.slane %v567_v27, %v6666_v59 }
 0x116   : > { %1803 = vxpose.xlu0.b32.start.end [1/1] (short) (narrow) %v6854_v60, 8  ;;  %v8205_v60 = vld [vmem:[#allocation11_spill] sm:$0xff] }
 0x117   : > { %v651_v51 = vcombine.low %v8205_v60, %v6875_v20  ;;  %v652_v27 = vcombine.high %v8205_v60, %v6875_v20  ;;  %8207 = vst [vmem:[#allocation11_spill] sm:$0xff] %v7090_v34  ;;  %v7096_v18 = vcombine.high %v7068_v4, %v8204_v5 }
 0x119   : > { %1963 = vxpose.xlu1.b32.start.end [1/1] (short) (narrow) %v531_v38, 8  ;;  %v7102_v20 = vrot.slane %v651_v51, %v6666_v59  ;;  %v7105_v60 = vrot.slane %v652_v27, %v6666_v59  ;;  %v8211_v38 = vld [vmem:[#allocation15_spill] sm:$0xff]  ;;  %v7121_v51 = vcombine.high %v7090_v34, %v8204_v5  ;;  %v7125_v27 = vcombine.high %v7099_v25, %v8204_v5  ;;  %v8219_v34 = vld [vmem:[#allocation9_spill] sm:$0xff] }
 0x11a   : > { %1867 = vxpose.xlu0.b32.start.end [1/1] (short) (narrow) %v8211_v38, 8  ;;  %8212 = vst [vmem:[#allocation15_spill] sm:$0xff] %v7113_v50  ;;  %v719_v50 = vcombine.low %v8219_v34, %v8218_v47  ;;  %v720_v25 = vcombine.high %v8219_v34, %v8218_v47  ;;  %v7164_v34 = vcombine.high %v7136_v6, %v8204_v5 }
 0x11b   : > { %8209 = vst [vmem:[#allocation20_spill] sm:$0xff] %v7102_v20  ;;  %8210 = vst [vmem:[#allocation21_spill] sm:$0xff] %v7105_v60  ;;  %v7129_v38 = vcombine.high %v7102_v20, %v8204_v5  ;;  %v7133_v33 = vcombine.high %v7105_v60, %v8204_v5  ;;  %v8221_v20 = vld [vmem:[#allocation12_spill] sm:$0xff] }
 0x11c   : > { %8215 = vst [vmem:[#allocation14_spill] sm:$0xff] %v7125_v27  ;;  %v8220_v27 = vld [vmem:[#allocation19_spill] sm:$0xff]  ;;  %v7174_v47 = vrot.slane %v720_v25, %v6666_v59 }
 0x11d   : > { %8216 = vst [vmem:[#allocation8_spill] sm:$0xff] %v7129_v38  ;;  %8217 = vst [vmem:[#allocation22_spill] sm:$0xff] %v7133_v33  ;;  %2027 = vxpose.xlu1.b32.start.end [1/1] (short) (narrow) %v532_v55, 8  ;;  %v771_v38 = vcombine.low %v8221_v20, %v8220_v27  ;;  %v772_v60 = vcombine.high %v8221_v20, %v8220_v27  ;;  %v7153_v55 = vrot.slane %v8222_v0, %v6666_v59 }
 0x11e   : > { %v7159_v33 = vrot.slane %v8224_v63, %v6666_v59  ;;  %1931 = vxpose.xlu0.b32.start.end [1/1] (short) (narrow) %v6989_v26, 8  ;;  %v7168_v20 = vcombine.high %v7139_v21, %v8204_v5  ;;  %v7171_v27 = vrot.slane %v719_v50, %v6666_v59  ;;  %v7196_v25 = vcombine.high %v7174_v47, %v8204_v5 }
 0x11f   : > { %8223 = vst [vmem:[#allocation16_spill] sm:$0xff] %v7153_v55  ;;  %v7177_v9 = vrot.slane %v771_v38, %v6666_v59  ;;  %v7180_v49 = vrot.slane %v772_v60, %v6666_v59  ;;  %v7184_v26 = vcombine.high %v7153_v55, %v8204_v5  ;;  %v8230_v60 = vld [vmem:[#allocation17_spill] sm:$0xff] }
 0x120   : > { %8225 = vst [vmem:[#allocation9_spill] sm:$0xff] %v7159_v33  ;;  %v7188_v0 = vcombine.high %v7159_v33, %v8204_v5  ;;  %v7192_v50 = vcombine.high %v7171_v27, %v8204_v5  ;;  %v8231_v38 = vcombine.low %v6721_v53, %v8230_v60  ;;  %v8232_v33 = vcombine.high %v6721_v53, %v8230_v60 }
 0x121   : > { %8226 = vst [vmem:[#allocation19_spill] sm:$0xff] %v7177_v9  ;;  %8227 = vst [vmem:[#allocation12_spill] sm:$0xff] %v7180_v49  ;;  %2091 = vxpose.xlu1.b32.start.end [1/1] (short) (narrow) %v533_v12, 8  ;;  %v7212_v12 = vcombine.high %v7177_v9, %v8204_v5  ;;  %v8236_v53 = vcombine.high %v6724_v54, %v6866_v23 }
 0x122   : > { %8228 = vst [vmem:[#allocation23_spill] sm:$0xff] %v7184_v26  ;;  %8229 = vst [vmem:[#allocation24_spill] sm:$0xff] %v7188_v0  ;;  %v7202_v63 = vrot.slane %v8231_v38, %v6666_v59  ;;  %v7208_v55 = vrot.slane %v8232_v33, %v6666_v59  ;;  %v7216_v0 = vcombine.high %v7180_v49, %v8204_v5  ;;  %1995 = vxpose.xlu0.b32.start.end [1/1] (short) (narrow) %v6992_v16, 8 }
 0x123   : > { %v8234_v26 = vcombine.low %v6724_v54, %v6866_v23  ;;  %v7228_v33 = vrot.slane %v8236_v53, %v6666_v59  ;;  %v8239_v54 = vcombine.high %v6744_v3, %v6917_v1 }
 0x124   : > { %8233 = vst [vmem:[#allocation17_spill] sm:$0xff] %v7208_v55  ;;  %v7233_v60 = vcombine.high %v7202_v63, %v8204_v5  ;;  %v7237_v49 = vcombine.high %v7208_v55, %v8204_v5  ;;  %v8241_v55 = vcombine.low %v6747_v2, %v6926_v37 }
 0x125   : > { %v7222_v38 = vrot.slane %v8234_v26, %v6666_v59  ;;  %8237 = vst [vmem:[#allocation26_spill] sm:$0xff] %v7228_v33  ;;  %v8238_v26 = vcombine.low %v6744_v3, %v6917_v1  ;;  %v7249_v23 = vrot.slane %v8239_v54, %v6666_v59  ;;  %v7257_v53 = vcombine.high %v7228_v33, %v8204_v5 }
 0x126   : > { %v8243_v3 = vcombine.high %v6747_v2, %v6926_v37  ;;  %2155 = vxpose.xlu1.b32.start.end [1/1] (short) (narrow) %v7056_v19, 8  ;;  %v8246_v2 = vcombine.high %v6733_v48, %v6909_v36  ;;  %2059 = vxpose.xlu0.b32.start.end [1/1] (short) (narrow) %v7021_v32, 8 }
 0x127   : > { %8235 = vst [vmem:[#allocation25_spill] sm:$0xff] %v7222_v38  ;;  %v7243_v9 = vrot.slane %v8238_v26, %v6666_v59  ;;  %8240 = vst [vmem:[#allocation27_spill] sm:$0xff] %v7249_v23  ;;  %v7253_v16 = vcombine.high %v7222_v38, %v8204_v5  ;;  %v7263_v26 = vrot.slane %v8241_v55, %v6666_v59 }
 0x128   : > { %v7269_v1 = vrot.slane %v8243_v3, %v6666_v59  ;;  %v7278_v33 = vcombine.high %v7249_v23, %v8204_v5  ;;  %v8245_v55 = vcombine.low %v6733_v48, %v6909_v36  ;;  %v7290_v37 = vrot.slane %v8246_v2, %v6666_v59 }
 0x129   : > { %8242 = vst [vmem:[#allocation28_spill] sm:$0xff] %v7263_v26  ;;  %v7274_v54 = vcombine.high %v7243_v9, %v8204_v5  ;;  %v7294_v19 = vcombine.high %v7263_v26, %v8204_v5  ;;  %v8248_v23 = vcombine.low %v6738_v57, %v6912_v22  ;;  %v8250_v48 = vcombine.high %v6738_v57, %v6912_v22 }
 0x12a   : > { %8244 = vst [vmem:[#allocation29_spill] sm:$0xff] %v7269_v1  ;;  %v7284_v38 = vrot.slane %v8245_v55, %v6666_v59  ;;  %8247 = vst [vmem:[#allocation30_spill] sm:$0xff] %v7290_v37  ;;  %v7298_v3 = vcombine.high %v7269_v1, %v8204_v5  ;;  %v7319_v1 = vcombine.high %v7290_v37, %v8204_v5  ;;  %2219 = vxpose.xlu1.b32.start.end [1/1] (short) (narrow) %v7096_v18, 8 }
 0x12b   : > { %v7304_v55 = vrot.slane %v8248_v23, %v6666_v59  ;;  %v7310_v36 = vrot.slane %v8250_v48, %v6666_v59  ;;  %v8252_v23 = vcombine.low %v6760_v45, %v6963_v28  ;;  %v8253_v57 = vcombine.high %v6760_v45, %v6963_v28  ;;  %2123 = vxpose.xlu0.b32.start.end [1/1] (short) (narrow) %v7024_v42, 8 }
 0x12c   : > { %v7315_v2 = vcombine.high %v7284_v38, %v8204_v5  ;;  %v8255_v37 = vcombine.low %v6763_v46, %v6966_v58  ;;  %v8257_v45 = vcombine.high %v6763_v46, %v6966_v58  ;;  %v8260_v46 = vcombine.high %v6750_v35, %v6942_v10 }
 0x12d   : > { %8249 = vst [vmem:[#allocation31_spill] sm:$0xff] %v7304_v55  ;;  %8251 = vst [vmem:[#allocation32_spill] sm:$0xff] %v7310_v36  ;;  %v7325_v26 = vrot.slane %v8252_v23, %v6666_v59  ;;  %v7331_v22 = vrot.slane %v8253_v57, %v6666_v59  ;;  %v7335_v32 = vcombine.high %v7304_v55, %v8204_v5 }
 0x12e   : > { %v7339_v48 = vcombine.high %v7310_v36, %v8204_v5  ;;  %v7345_v23 = vrot.slane %v8255_v37, %v6666_v59  ;;  %v7351_v28 = vrot.slane %v8257_v45, %v6666_v59  ;;  %v8259_v37 = vcombine.low %v6750_v35, %v6942_v10  ;;  %2283 = vxpose.xlu1.b32.start.end [1/1] (short) (narrow) %v7110_v30, 8 }
 0x12f   : > { %8254 = vst [vmem:[#allocation33_spill] sm:$0xff] %v7331_v22  ;;  %v7356_v57 = vcombine.high %v7325_v26, %v8204_v5  ;;  %v7360_v36 = vcombine.high %v7331_v22, %v8204_v5  ;;  %v7372_v58 = vrot.slane %v8260_v46, %v6666_v59  ;;  %v8262_v22 = vcombine.low %v6753_v11, %v6945_v24 }
 0x130   : > { %8256 = vst [vmem:[#allocation34_spill] sm:$0xff] %v7345_v23  ;;  %8258 = vst [vmem:[#allocation35_spill] sm:$0xff] %v7351_v28  ;;  %v7366_v55 = vrot.slane %v8259_v37, %v6666_v59  ;;  %v7376_v18 = vcombine.high %v7345_v23, %v8204_v5  ;;  %v7380_v45 = vcombine.high %v7351_v28, %v8204_v5  ;;  %2187 = vxpose.xlu0.b32.start.end [1/1] (short) (narrow) %v7068_v4, 8 }
 0x131   : > { %8261 = vst [vmem:[#allocation36_spill] sm:$0xff] %v7372_v58  ;;  %v7386_v37 = vrot.slane %v8262_v22, %v6666_v59  ;;  %v8264_v35 = vcombine.high %v6753_v11, %v6945_v24  ;;  %v7401_v28 = vcombine.high %v7372_v58, %v8204_v5  ;;  %v8266_v22 = vcombine.low %v6774_v14, %v6986_v7 }
 0x132   : > { %v7397_v46 = vcombine.high %v7366_v55, %v8204_v5  ;;  %v8267_v11 = vcombine.high %v6774_v14, %v6986_v7  ;;  %v8269_v58 = vcombine.low %v6782_v17, %v6981_v44  ;;  %v8271_v14 = vcombine.high %v6782_v17, %v6981_v44  ;;  %2347 = vxpose.xlu1.b32.start.end [1/1] (short) (narrow) %v7121_v51, 8 }
 0x133   : > { %8263 = vst [vmem:[#allocation37_spill] sm:$0xff] %v7386_v37  ;;  %v7392_v10 = vrot.slane %v8264_v35, %v6666_v59  ;;  %v7407_v23 = vrot.slane %v8266_v22, %v6666_v59  ;;  %v7417_v42 = vcombine.high %v7386_v37, %v8204_v5  ;;  %v8274_v17 = vcombine.high %v6768_v13, %v6969_v29 }
 0x134   : > { %v7413_v24 = vrot.slane %v8267_v11, %v6666_v59  ;;  %v7427_v22 = vrot.slane %v8269_v58, %v6666_v59  ;;  %v7433_v7 = vrot.slane %v8271_v14, %v6666_v59  ;;  %v8273_v58 = vcombine.low %v6768_v13, %v6969_v29  ;;  %2251 = vxpose.xlu0.b32.start.end [1/1] (short) (narrow) %v7071_v41, 8  ;;  %v8300_v41 = vld [vmem:[#allocation11_spill] sm:$0xff] }
 0x135   : > { %8265 = vst [vmem:[#allocation38_spill] sm:$0xff] %v7392_v10  ;;  %v7421_v35 = vcombine.high %v7392_v10, %v8204_v5  ;;  %v7438_v11 = vcombine.high %v7407_v23, %v8204_v5  ;;  %v7454_v44 = vrot.slane %v8274_v17, %v6666_v59  ;;  %v8278_v13 = vcombine.high %v6771_v40, %v6972_v8 }
 0x136   : > { %8268 = vst [vmem:[#allocation39_spill] sm:$0xff] %v7413_v24  ;;  %8270 = vst [vmem:[#allocation40_spill] sm:$0xff] %v7427_v22  ;;  %v7442_v10 = vcombine.high %v7413_v24, %v8204_v5  ;;  %v7448_v37 = vrot.slane %v8273_v58, %v6666_v59  ;;  %v7458_v30 = vcombine.high %v7427_v22, %v8204_v5 }
 0x137   : > { %8272 = vst [vmem:[#allocation41_spill] sm:$0xff] %v7433_v7  ;;  %8275 = vst [vmem:[#allocation42_spill] sm:$0xff] %v7454_v44  ;;  %v7462_v14 = vcombine.high %v7433_v7, %v8204_v5  ;;  %v8276_v24 = vcombine.low %v6771_v40, %v6972_v8  ;;  %v7474_v29 = vrot.slane %v8278_v13, %v6666_v59 }
 0x138   : > { %v7479_v17 = vcombine.high %v7448_v37, %v8204_v5  ;;  %v7483_v7 = vcombine.high %v7454_v44, %v8204_v5  ;;  %v8282_v40 = vcombine.high %v6791_v62, %v7035_v39  ;;  %v8284_v44 = vcombine.low %v8206_v43, %v7049_v15  ;;  %2315 = vxpose.xlu0.b32.start.end [1/1] (short) (narrow) %v8300_v41, 8  ;;  %v8319_v41 = vld [vmem:[#allocation30_spill] sm:$0xff] }
 0x139   : > { %v7468_v58 = vrot.slane %v8276_v24, %v6666_v59  ;;  %8279 = vst [vmem:[#allocation44_spill] sm:$0xff] %v7474_v29  ;;  %v8280_v24 = vcombine.low %v6791_v62, %v7035_v39  ;;  %v7503_v13 = vcombine.high %v7474_v29, %v8204_v5  ;;  %v8286_v62 = vcombine.high %v8206_v43, %v7049_v15 }
 0x13a   : > { %v7495_v8 = vrot.slane %v8282_v40, %v6666_v59  ;;  %v8290_v15 = vcombine.high %v6785_v56, %v7029_v52 }
 0x13b   : > { %8277 = vst [vmem:[#allocation43_spill] sm:$0xff] %v7468_v58  ;;  %v7489_v22 = vrot.slane %v8280_v24, %v6666_v59  ;;  %v7499_v4 = vcombine.high %v7468_v58, %v8204_v5  ;;  %v7509_v24 = vrot.slane %v8284_v44, %v6666_v59  ;;  %v7515_v39 = vrot.slane %v8286_v62, %v6666_v59 }
 0x13c   : > { %8283 = vst [vmem:[#allocation46_spill] sm:$0xff] %v7495_v8  ;;  %v7524_v29 = vcombine.high %v7495_v8, %v8204_v5  ;;  %v8289_v44 = vcombine.low %v6785_v56, %v7029_v52  ;;  %v7536_v43 = vrot.slane %v8290_v15, %v6666_v59  ;;  %v8293_v8 = vcombine.low %v6788_v61, %v7032_v31  ;;  %v8296_v15 = vld [vmem:[#allocation15_spill] sm:$0xff] }
 0x13d   : > { %8281 = vst [vmem:[#allocation45_spill] sm:$0xff] %v7489_v22  ;;  %8285 = vst [vmem:[#allocation47_spill] sm:$0xff] %v7509_v24  ;;  %v7520_v40 = vcombine.high %v7489_v22, %v8204_v5  ;;  %v7540_v51 = vcombine.high %v7509_v24, %v8204_v5  ;;  %v7544_v62 = vcombine.high %v7515_v39, %v8204_v5  ;;  %2379 = vxpose.xlu0.b32.start.end [1/1] (short) (narrow) %v8296_v15, 8 }
 0x13e   : > { %8287 = vst [vmem:[#allocation48_spill] sm:$0xff] %v7515_v39  ;;  %8288 = vst [vmem:[#allocation49_spill] sm:$0xff] %v7524_v29  ;;  %v7530_v58 = vrot.slane %v8289_v44, %v6666_v59  ;;  %v7550_v44 = vrot.slane %v8293_v8, %v6666_v59  ;;  %v8295_v56 = vcombine.high %v6788_v61, %v7032_v31  ;;  %v8297_v39 = vld [vmem:[#allocation10_spill] sm:$0xff] }
 0x13f   : > { %8291 = vst [vmem:[#allocation50_spill] sm:$0xff] %v7540_v51  ;;  %8292 = vst [vmem:[#allocation51_spill] sm:$0xff] %v7544_v62  ;;  %v602_v24 = vcombine.high %v8296_v15, %v8204_v5  ;;  %v8298_v62 = vld [vmem:[#allocation18_spill] sm:$0xff]  ;;  %v7571_v29 = vcombine.high %v7536_v43, %v8204_v5 }
 0x140   : > { %8294 = vst [vmem:[#allocation52_spill] sm:$0xff] %v7550_v44  ;;  %v7556_v52 = vrot.slane %v8295_v56, %v6666_v59  ;;  %v8299_v51 = vcombine.low %v8297_v39, %v8298_v62  ;;  %v7567_v8 = vcombine.high %v7530_v58, %v8204_v5  ;;  %v7575_v61 = vcombine.high %v7550_v44, %v8204_v5  ;;  %v8301_v39 = vld [vmem:[#allocation14_spill] sm:$0xff]  ;;  %v8303_v62 = vld [vmem:[#allocation13_spill] sm:$0xff]  ;;  %v8305_v44 = vld [vmem:[#allocation20_spill] sm:$0xff] }
 0x141   : > { %2411 = vxpose.xlu1.b32.start.end [1/1] (short) (narrow) %v602_v24, 8  ;;  %v8304_v56 = vld [vmem:[#allocation22_spill] sm:$0xff]  ;;  %v8306_v24 = vld [vmem:[#allocation21_spill] sm:$0xff] }
 0x142   : > { %v643_v22 = vrot.slane %v8299_v51, %v6666_v59  ;;  %v7579_v31 = vcombine.high %v7556_v52, %v8204_v5  ;;  %v8302_v51 = vld [vmem:[#allocation8_spill] sm:$0xff] }
 0x144   : > { %v667_v59 = vcombine.high %v643_v22, %v8204_v5  ;;  %2443 = vxpose.xlu0.b32.start.end [1/1] (short) (narrow) %v643_v22, 8  ;;  %v8307_v5 = vld [vmem:[#allocation19_spill] sm:$0xff]  ;;  %v8318_v22 = vld [vmem:[#allocation29_spill] sm:$0xff] }
 0x146   : > { %2475 = vxpose.xlu1.b32.start.end [1/1] (short) (narrow) %v667_v59, 8 }
 0x148   : > { %2507 = vxpose.xlu0.b32.start.end [1/1] (short) (narrow) %v8303_v62, 8 }
 0x14a   : > { %2539 = vxpose.xlu1.b32.start.end [1/1] (short) (narrow) %v8301_v39, 8  ;;  %v8320_v39 = vld [vmem:[#allocation31_spill] sm:$0xff] }
 0x14c   : > { %2571 = vxpose.xlu0.b32.start.end [1/1] (short) (narrow) %v8305_v44, 8 }
 0x14e   : > { %2603 = vxpose.xlu1.b32.start.end [1/1] (short) (narrow) %v8302_v51, 8  ;;  %v8321_v51 = vld [vmem:[#allocation32_spill] sm:$0xff] }
 0x150   : > { %2635 = vxpose.xlu0.b32.start.end [1/1] (short) (narrow) %v8306_v24, 8  ;;  %v8322_v24 = vld [vmem:[#allocation33_spill] sm:$0xff] }
 0x152   : > { %2667 = vxpose.xlu1.b32.start.end [1/1] (short) (narrow) %v8304_v56, 8 }
 0x154   : > { %2699 = vxpose.xlu0.b32.start.end [1/1] (short) (narrow) %v7136_v6, 8  ;;  %v8310_v6 = vld [vmem:[#allocation24_spill] sm:$0xff] }
 0x156   : > { %2731 = vxpose.xlu1.b32.start.end [1/1] (short) (narrow) %v7164_v34, 8  ;;  %v8308_v34 = vld [vmem:[#allocation23_spill] sm:$0xff] }
 0x158   : > { %2763 = vxpose.xlu0.b32.start.end [1/1] (short) (narrow) %v7139_v21, 8  ;;  %v8312_v21 = vld [vmem:[#allocation9_spill] sm:$0xff] }
 0x15a   : > { %2795 = vxpose.xlu1.b32.start.end [1/1] (short) (narrow) %v7168_v20, 8  ;;  %v8309_v20 = vld [vmem:[#allocation12_spill] sm:$0xff] }
 0x15c   : > { %2827 = vxpose.xlu0.b32.start.end [1/1] (short) (narrow) %v7171_v27, 8  ;;  %v8313_v27 = vld [vmem:[#allocation17_spill] sm:$0xff] }
 0x15e   : > { %2859 = vxpose.xlu1.b32.start.end [1/1] (short) (narrow) %v7192_v50, 8  ;;  %v8311_v50 = vld [vmem:[#allocation16_spill] sm:$0xff] }
 0x160   : > { %2891 = vxpose.xlu0.b32.start.end [1/1] (short) (narrow) %v7174_v47, 8  ;;  %v8314_v47 = vld [vmem:[#allocation25_spill] sm:$0xff] }
 0x162   : > { %2923 = vxpose.xlu1.b32.start.end [1/1] (short) (narrow) %v7196_v25, 8 }
 0x164   : > { %2955 = vxpose.xlu0.b32.start.end [1/1] (short) (narrow) %v8307_v5, 8 }
 0x166   : > { %2987 = vxpose.xlu1.b32.start.end [1/1] (short) (narrow) %v7212_v12, 8 }
 0x168   : > { %3019 = vxpose.xlu0.b32.start.end [1/1] (short) (narrow) %v8309_v20, 8  ;;  %v8324_v20 = vld [vmem:[#allocation35_spill] sm:$0xff] }
 0x16a   : > { %3051 = vxpose.xlu1.b32.start.end [1/1] (short) (narrow) %v7216_v0, 8  ;;  %v8315_v0 = vld [vmem:[#allocation26_spill] sm:$0xff] }
 0x16c   : > { %3083 = vxpose.xlu0.b32.start.end [1/1] (short) (narrow) %v8311_v50, 8 }
 0x16e   : > { %3115 = vxpose.xlu1.b32.start.end [1/1] (short) (narrow) %v8308_v34, 8  ;;  %v8323_v34 = vld [vmem:[#allocation34_spill] sm:$0xff] }
 0x170   : > { %3147 = vxpose.xlu0.b32.start.end [1/1] (short) (narrow) %v8312_v21, 8  ;;  %v8325_v21 = vld [vmem:[#allocation36_spill] sm:$0xff] }
 0x172   : > { %3179 = vxpose.xlu1.b32.start.end [1/1] (short) (narrow) %v8310_v6, 8 }
 0x174   : > { %3211 = vxpose.xlu0.b32.start.end [1/1] (short) (narrow) %v7202_v63, 8 }
 0x176   : > { %3243 = vxpose.xlu1.b32.start.end [1/1] (short) (narrow) %v7233_v60, 8  ;;  %v8316_v60 = vld [vmem:[#allocation27_spill] sm:$0xff] }
 0x178   : > { %3275 = vxpose.xlu0.b32.start.end [1/1] (short) (narrow) %v8313_v27, 8 }
 0x17a   : > { %3307 = vxpose.xlu1.b32.start.end [1/1] (short) (narrow) %v7237_v49, 8  ;;  %v7615_v25 = vpop.trf.xlu0 }
 0x17c   : > { %3339 = vxpose.xlu0.b32.start.end [1/1] (short) (narrow) %v8314_v47, 8  ;;  %v8326_v47 = vld [vmem:[#allocation37_spill] sm:$0xff] }
 0x17d   : > { %v7618_v12 = vpop.trf.xlu1 }
 0x17e   : > { %3371 = vxpose.xlu1.b32.start.end [1/1] (short) (narrow) %v7253_v16, 8  ;;  %v7621_v49 = vpop.trf.xlu0 }
 0x180   : > { %3403 = vxpose.xlu0.b32.start.end [1/1] (short) (narrow) %v8315_v0, 8  ;;  %v8327_v0 = vld [vmem:[#allocation38_spill] sm:$0xff] }
 0x181   : > { %v7624_v63 = vpop.trf.xlu1 }
 0x182   : > { %3435 = vxpose.xlu1.b32.start.end [1/1] (short) (narrow) %v7257_v53, 8  ;;  %v7627_v16 = vpop.trf.xlu0 }
 0x184   : > { %3467 = vxpose.xlu0.b32.start.end [1/1] (short) (narrow) %v7243_v9, 8 }
 0x185   : > { %v7630_v53 = vpop.trf.xlu1 }
 0x186   : > { %3499 = vxpose.xlu1.b32.start.end [1/1] (short) (narrow) %v7274_v54, 8  ;;  %v8317_v54 = vld [vmem:[#allocation28_spill] sm:$0xff] }
 0x188   : > { %3531 = vxpose.xlu0.b32.start.end [1/1] (short) (narrow) %v8316_v60, 8 }
 0x189   : > { %v7636_v9 = vpop.trf.xlu1 }
 0x18a   : > { %3563 = vxpose.xlu1.b32.start.end [1/1] (short) (narrow) %v7278_v33, 8  ;;  %v7633_v33 = vpop.trf.xlu0 }
 0x18c   : > { %3595 = vxpose.xlu0.b32.start.end [1/1] (short) (narrow) %v8317_v54, 8 }
 0x18d   : > { %v7642_v44 = vpop.trf.xlu1 }
 0x18e   : > { %3627 = vxpose.xlu1.b32.start.end [1/1] (short) (narrow) %v7294_v19, 8  ;;  %v7639_v19 = vpop.trf.xlu0 }
 0x190   : > { %3659 = vxpose.xlu0.b32.start.end [1/1] (short) (narrow) %v8318_v22, 8  ;;  %v8328_v22 = vld [vmem:[#allocation39_spill] sm:$0xff] }
 0x191   : > { %v7648_v15 = vpop.trf.xlu1 }
 0x192   : > { %3691 = vxpose.xlu1.b32.start.end [1/1] (short) (narrow) %v7298_v3, 8  ;;  %v7645_v3 = vpop.trf.xlu0 }
 0x194   : > { %3723 = vxpose.xlu0.b32.start.end [1/1] (short) (narrow) %v7284_v38, 8 }
 0x195   : > { %v7654_v59 = vpop.trf.xlu1 }
 0x196   : > { %3755 = vxpose.xlu1.b32.start.end [1/1] (short) (narrow) %v7315_v2, 8  ;;  %v7651_v2 = vpop.trf.xlu0 }
 0x198   : > { %3787 = vxpose.xlu0.b32.start.end [1/1] (short) (narrow) %v8319_v41, 8 }
 0x199   : > { %v7660_v38 = vpop.trf.xlu1 }
 0x19a   : > { %3819 = vxpose.xlu1.b32.start.end [1/1] (short) (narrow) %v7319_v1, 8  ;;  %v7657_v1 = vpop.trf.xlu0 }
 0x19c   : > { %3851 = vxpose.xlu0.b32.start.end [1/1] (short) (narrow) %v8320_v39, 8  ;;  %v8330_v39 = vld [vmem:[#allocation40_spill] sm:$0xff] }
 0x19d   : > { %v7666_v62 = vpop.trf.xlu1 }
 0x19e   : > { %3883 = vxpose.xlu1.b32.start.end [1/1] (short) (narrow) %v7335_v32, 8  ;;  %v7663_v32 = vpop.trf.xlu0 }
 0x1a0   : > { %3915 = vxpose.xlu0.b32.start.end [1/1] (short) (narrow) %v8321_v51, 8  ;;  %v8331_v51 = vld [vmem:[#allocation41_spill] sm:$0xff] }
 0x1a1   : > { %v7672_v56 = vpop.trf.xlu1 }
 0x1a2   : > { %3947 = vxpose.xlu1.b32.start.end [1/1] (short) (narrow) %v7339_v48, 8  ;;  %v7669_v48 = vpop.trf.xlu0 }
 0x1a4   : > { %3979 = vxpose.xlu0.b32.start.end [1/1] (short) (narrow) %v7325_v26, 8 }
 0x1a6   : > { %4011 = vxpose.xlu1.b32.start.end [1/1] (short) (narrow) %v7356_v57, 8  ;;  %v7675_v57 = vpop.trf.xlu0  ;;  %v7678_v5 = vpop.trf.xlu1 }
 0x1a8   : > { %4043 = vxpose.xlu0.b32.start.end [1/1] (short) (narrow) %v8322_v24, 8 }
 0x1aa   : > { %4075 = vxpose.xlu1.b32.start.end [1/1] (short) (narrow) %v7360_v36, 8  ;;  %v7681_v36 = vpop.trf.xlu0  ;;  %v7684_v26 = vpop.trf.xlu1 }
 0x1ac   : > { %4107 = vxpose.xlu0.b32.start.end [1/1] (short) (narrow) %v8323_v34, 8 }
 0x1ae   : > { %4139 = vxpose.xlu1.b32.start.end [1/1] (short) (narrow) %v7376_v18, 8  ;;  %v7687_v18 = vpop.trf.xlu0  ;;  %v7690_v6 = vpop.trf.xlu1 }
 0x1b0   : > { %4171 = vxpose.xlu0.b32.start.end [1/1] (short) (narrow) %v8324_v20, 8  ;;  %v8333_v20 = vld [vmem:[#allocation42_spill] sm:$0xff] }
 0x1b2   : > { %4203 = vxpose.xlu1.b32.start.end [1/1] (short) (narrow) %v7380_v45, 8  ;;  %v7693_v45 = vpop.trf.xlu0  ;;  %v7696_v50 = vpop.trf.xlu1 }
 0x1b4   : > { %4235 = vxpose.xlu0.b32.start.end [1/1] (short) (narrow) %v7366_v55, 8 }
 0x1b6   : > { %4267 = vxpose.xlu1.b32.start.end [1/1] (short) (narrow) %v7397_v46, 8  ;;  %v7699_v46 = vpop.trf.xlu0 }
 0x1b8   : > { %4299 = vxpose.xlu0.b32.start.end [1/1] (short) (narrow) %v8325_v21, 8 }
 0x1ba   : > { %4331 = vxpose.xlu1.b32.start.end [1/1] (short) (narrow) %v7401_v28, 8  ;;  %v7705_v28 = vpop.trf.xlu0 }
 0x1bc   : > { %4363 = vxpose.xlu0.b32.start.end [1/1] (short) (narrow) %v8326_v47, 8  ;;  %v8334_v47 = vld [vmem:[#allocation43_spill] sm:$0xff] }
 0x1be   : > { %4395 = vxpose.xlu1.b32.start.end [1/1] (short) (narrow) %v7417_v42, 8  ;;  %v7711_v42 = vpop.trf.xlu0 }
 0x1c0   : > { %4427 = vxpose.xlu0.b32.start.end [1/1] (short) (narrow) %v8327_v0, 8  ;;  %v8336_v0 = vld [vmem:[#allocation44_spill] sm:$0xff] }
 0x1c1   : > { %v7702_v27 = vpop.trf.xlu1 }
 0x1c2   : > { %4459 = vxpose.xlu1.b32.start.end [1/1] (short) (narrow) %v7421_v35, 8 }
 0x1c4   : > { %4491 = vxpose.xlu0.b32.start.end [1/1] (short) (narrow) %v7407_v23, 8  ;;  %v7717_v35 = vpop.trf.xlu0 }
 0x1c6   : > { %4523 = vxpose.xlu1.b32.start.end [1/1] (short) (narrow) %v7438_v11, 8  ;;  %v7708_v55 = vpop.trf.xlu1 }
 0x1c8   : > { %4555 = vxpose.xlu0.b32.start.end [1/1] (short) (narrow) %v8328_v22, 8  ;;  %v7723_v11 = vpop.trf.xlu0  ;;  %v8337_v22 = vld [vmem:[#allocation49_spill] sm:$0xff] }
 0x1ca   : > { %4587 = vxpose.xlu1.b32.start.end [1/1] (short) (narrow) %v7442_v10, 8  ;;  %v7714_v60 = vpop.trf.xlu1 }
 0x1cc   : > { %4619 = vxpose.xlu0.b32.start.end [1/1] (short) (narrow) %v8330_v39, 8  ;;  %v7729_v10 = vpop.trf.xlu0 }
 0x1ce   : > { %4651 = vxpose.xlu1.b32.start.end [1/1] (short) (narrow) %v7458_v30, 8  ;;  %v7720_v54 = vpop.trf.xlu1 }
 0x1d0   : > { %4683 = vxpose.xlu0.b32.start.end [1/1] (short) (narrow) %v8331_v51, 8  ;;  %v7735_v30 = vpop.trf.xlu0  ;;  %v8339_v51 = vld [vmem:[#allocation45_spill] sm:$0xff] }
 0x1d1   : > { %8332 = vst [vmem:[#allocation10_spill] sm:$0xff] %v7735_v30  ;;  %v8344_v30 = vld [vmem:[#allocation47_spill] sm:$0xff] }
 0x1d2   : > { %4715 = vxpose.xlu1.b32.start.end [1/1] (short) (narrow) %v7462_v14, 8  ;;  %v7726_v41 = vpop.trf.xlu1 }
 0x1d3   : > { %8329 = vst [vmem:[#allocation15_spill] sm:$0xff] %v7726_v41  ;;  %v8341_v41 = vld [vmem:[#allocation46_spill] sm:$0xff] }
 0x1d4   : > { %4747 = vxpose.xlu0.b32.start.end [1/1] (short) (narrow) %v7448_v37, 8  ;;  %v7741_v14 = vpop.trf.xlu0 }
 0x1d6   : > { %4779 = vxpose.xlu1.b32.start.end [1/1] (short) (narrow) %v7479_v17, 8  ;;  %v7732_v23 = vpop.trf.xlu1 }
 0x1d8   : > { %4811 = vxpose.xlu0.b32.start.end [1/1] (short) (narrow) %v8333_v20, 8  ;;  %v7747_v17 = vpop.trf.xlu0  ;;  %v8340_v20 = vld [vmem:[#allocation50_spill] sm:$0xff] }
 0x1da   : > { %4843 = vxpose.xlu1.b32.start.end [1/1] (short) (narrow) %v7483_v7, 8  ;;  %v7738_v24 = vpop.trf.xlu1 }
 0x1dc   : > { %4875 = vxpose.xlu0.b32.start.end [1/1] (short) (narrow) %v8334_v47, 8  ;;  %v7753_v7 = vpop.trf.xlu0 }
 0x1de   : > { %4907 = vxpose.xlu1.b32.start.end [1/1] (short) (narrow) %v7499_v4, 8  ;;  %v7744_v34 = vpop.trf.xlu1 }
 0x1e0   : > { %4939 = vxpose.xlu0.b32.start.end [1/1] (short) (narrow) %v8336_v0, 8  ;;  %v7759_v4 = vpop.trf.xlu0 }
 0x1e2   : > { %4971 = vxpose.xlu1.b32.start.end [1/1] (short) (narrow) %v7503_v13, 8  ;;  %v7750_v21 = vpop.trf.xlu1 }
 0x1e4   : > { %5003 = vxpose.xlu0.b32.start.end [1/1] (short) (narrow) %v8339_v51, 8  ;;  %v7765_v13 = vpop.trf.xlu0 }
 0x1e6   : > { %5035 = vxpose.xlu1.b32.start.end [1/1] (short) (narrow) %v7520_v40, 8  ;;  %v7756_v37 = vpop.trf.xlu1 }
 0x1e7   : > { %8335 = vst [vmem:[#allocation18_spill] sm:$0xff] %v7756_v37  ;;  %v8342_v37 = vld [vmem:[#allocation51_spill] sm:$0xff] }
 0x1e8   : > { %5067 = vxpose.xlu0.b32.start.end [1/1] (short) (narrow) %v8341_v41, 8  ;;  %v7771_v40 = vpop.trf.xlu0 }
 0x1ea   : > { %5099 = vxpose.xlu1.b32.start.end [1/1] (short) (narrow) %v8337_v22, 8  ;;  %v7762_v39 = vpop.trf.xlu1 }
 0x1eb   : > { %8338 = vst [vmem:[#allocation11_spill] sm:$0xff] %v7762_v39  ;;  %v8345_v39 = vld [vmem:[#allocation48_spill] sm:$0xff] }
 0x1ec   : > { %5131 = vxpose.xlu0.b32.start.end [1/1] (short) (narrow) %v8344_v30, 8  ;;  %v7777_v22 = vpop.trf.xlu0 }
 0x1ee   : > { %5163 = vxpose.xlu1.b32.start.end [1/1] (short) (narrow) %v8340_v20, 8  ;;  %v7768_v47 = vpop.trf.xlu1 }
 0x1f0   : > { %5195 = vxpose.xlu0.b32.start.end [1/1] (short) (narrow) %v8345_v39, 8  ;;  %v7783_v20 = vpop.trf.xlu0 }
 0x1f2   : > { %5227 = vxpose.xlu1.b32.start.end [1/1] (short) (narrow) %v8342_v37, 8  ;;  %v7774_v0 = vpop.trf.xlu1 }
 0x1f3   : > { %8343 = vst [vmem:[#allocation14_spill] sm:$0xff] %v7774_v0  ;;  %v8346_v0 = vld [vmem:[#allocation52_spill] sm:$0xff] }
 0x1f4   : > { %5259 = vxpose.xlu0.b32.start.end [1/1] (short) (narrow) %v7530_v58, 8  ;;  %v7789_v37 = vpop.trf.xlu0 }
 0x1f6   : > { %5291 = vxpose.xlu1.b32.start.end [1/1] (short) (narrow) %v7567_v8, 8  ;;  %v7780_v51 = vpop.trf.xlu1 }
 0x1f8   : > { %5323 = vxpose.xlu0.b32.start.end [1/1] (short) (narrow) %v7536_v43, 8  ;;  %v7795_v8 = vpop.trf.xlu0 }
 0x1fa   : > { %5355 = vxpose.xlu1.b32.start.end [1/1] (short) (narrow) %v7571_v29, 8  ;;  %v7786_v41 = vpop.trf.xlu1 }
 0x1fc   : > { %5387 = vxpose.xlu0.b32.start.end [1/1] (short) (narrow) %v8346_v0, 8  ;;  %v7801_v29 = vpop.trf.xlu0 }
 0x1fe   : > { %5419 = vxpose.xlu1.b32.start.end [1/1] (short) (narrow) %v7575_v61, 8  ;;  %v7792_v30 = vpop.trf.xlu1 }
 0x200   : > { %5451 = vxpose.xlu0.b32.start.end [1/1] (short) (narrow) %v7556_v52, 8  ;;  %v7807_v61 = vpop.trf.xlu0 }
 0x202   : > { %5483 = vxpose.xlu1.b32.start.end [1/1] (short) (narrow) %v7579_v31, 8  ;;  %v7798_v39 = vpop.trf.xlu1 }
 0x204   : > { %5515 = vxpose.xlu0.b32.start [1/8] (short) (narrow) %v7615_v25, 8  ;;  %v7813_v31 = vpop.trf.xlu0 }
 0x206   : > { %5547 = vxpose.xlu1.b32.start [1/8] (short) (narrow) %v7645_v3, 8  ;;  %v7804_v58 = vpop.trf.xlu1 }
 0x208   : > { %5516 = vxpose.xlu0.b32.cont [2/8] (short) (narrow) %v7618_v12, 8  ;;  %v7819_v3 = vpop.trf.xlu0 }
 0x20a   : > { %5548 = vxpose.xlu1.b32.cont [2/8] (short) (narrow) %v7636_v9, 8  ;;  %v7810_v43 = vpop.trf.xlu1 }
 0x20c   : > { %5517 = vxpose.xlu0.b32.cont [3/8] (short) (narrow) %v7621_v49, 8  ;;  %v7825_v9 = vpop.trf.xlu0 }
 0x20e   : > { %5549 = vxpose.xlu1.b32.cont [3/8] (short) (narrow) %v7651_v2, 8  ;;  %v7816_v0 = vpop.trf.xlu1 }
 0x210   : > { %5518 = vxpose.xlu0.b32.cont [4/8] (short) (narrow) %v7627_v16, 8  ;;  %v7831_v2 = vpop.trf.xlu0 }
 0x212   : > { %5550 = vxpose.xlu1.b32.cont [4/8] (short) (narrow) %v7642_v44, 8  ;;  %v7822_v52 = vpop.trf.xlu1 }
 0x214   : > { %5519 = vxpose.xlu0.b32.cont [5/8] (short) (narrow) %v7633_v33, 8  ;;  %v7837_v44 = vpop.trf.xlu0 }
 0x216   : > { %5551 = vxpose.xlu1.b32.cont [5/8] (short) (narrow) %v7657_v1, 8  ;;  %v7828_v25 = vpop.trf.xlu1 }
 0x218   : > { %5520 = vxpose.xlu0.b32.cont [6/8] (short) (narrow) %v7624_v63, 8  ;;  %v7843_v1 = vpop.trf.xlu0 }
 0x21a   : > { %5552 = vxpose.xlu1.b32.cont [6/8] (short) (narrow) %v7648_v15, 8  ;;  %v7834_v12 = vpop.trf.xlu1 }
 0x21c   : > { %5521 = vxpose.xlu0.b32.cont [7/8] (short) (narrow) %v7639_v19, 8  ;;  %v7849_v15 = vpop.trf.xlu0 }
 0x21e   : > { %5553 = vxpose.xlu1.b32.cont [7/8] (short) (narrow) %v7663_v32, 8  ;;  %v7840_v49 = vpop.trf.xlu1 }
 0x220   : > { %5522 = vxpose.xlu0.b32.end [8/8] (short) (narrow) %v7630_v53, 8  ;;  %v7855_v32 = vpop.trf.xlu0 }
 0x222   : > { %5554 = vxpose.xlu1.b32.end [8/8] (short) (narrow) %v7654_v59, 8  ;;  %v7846_v16 = vpop.trf.xlu1 }
 0x224   : > { %5579 = vxpose.xlu0.b32.start [1/8] (short) (narrow) %v7669_v48, 8  ;;  %v7861_v59 = vpop.trf.xlu0 }
 0x226   : > { %5611 = vxpose.xlu1.b32.start [1/8] (short) (narrow) %v7693_v45, 8  ;;  %v7852_v33 = vpop.trf.xlu1 }
 0x228   : > { %5580 = vxpose.xlu0.b32.cont [2/8] (short) (narrow) %v7660_v38, 8  ;;  %v7867_v45 = vpop.trf.xlu0 }
 0x22a   : > { %5612 = vxpose.xlu1.b32.cont [2/8] (short) (narrow) %v7684_v26, 8  ;;  %v7858_v63 = vpop.trf.xlu1 }
 0x22c   : > { %5581 = vxpose.xlu0.b32.cont [3/8] (short) (narrow) %v7675_v57, 8  ;;  %v7873_v26 = vpop.trf.xlu0 }
 0x22e   : > { %5613 = vxpose.xlu1.b32.cont [3/8] (short) (narrow) %v7699_v46, 8  ;;  %v7864_v19 = vpop.trf.xlu1 }
 0x230   : > { %5582 = vxpose.xlu0.b32.cont [4/8] (short) (narrow) %v7666_v62, 8  ;;  %v7879_v46 = vpop.trf.xlu0 }
 0x232   : > { %5614 = vxpose.xlu1.b32.cont [4/8] (short) (narrow) %v7690_v6, 8  ;;  %v7870_v53 = vpop.trf.xlu1 }
 0x234   : > { %5583 = vxpose.xlu0.b32.cont [5/8] (short) (narrow) %v7681_v36, 8  ;;  %v7885_v6 = vpop.trf.xlu0 }
 0x236   : > { %5615 = vxpose.xlu1.b32.cont [5/8] (short) (narrow) %v7705_v28, 8  ;;  %v7876_v48 = vpop.trf.xlu1 }
 0x238   : > { %5584 = vxpose.xlu0.b32.cont [6/8] (short) (narrow) %v7672_v56, 8  ;;  %v7891_v28 = vpop.trf.xlu0 }
 0x23a   : > { %5616 = vxpose.xlu1.b32.cont [6/8] (short) (narrow) %v7696_v50, 8  ;;  %v7882_v38 = vpop.trf.xlu1 }
 0x23c   : > { %5585 = vxpose.xlu0.b32.cont [7/8] (short) (narrow) %v7687_v18, 8  ;;  %v7897_v50 = vpop.trf.xlu0 }
 0x23e   : > { %5617 = vxpose.xlu1.b32.cont [7/8] (short) (narrow) %v7711_v42, 8  ;;  %v7888_v57 = vpop.trf.xlu1 }
 0x240   : > { %5586 = vxpose.xlu0.b32.end [8/8] (short) (narrow) %v7678_v5, 8  ;;  %v7903_v42 = vpop.trf.xlu0 }
 0x242   : > { %5618 = vxpose.xlu1.b32.end [8/8] (short) (narrow) %v7702_v27, 8  ;;  %v7894_v62 = vpop.trf.xlu1 }
 0x244   : > { %5643 = vxpose.xlu0.b32.start [1/8] (short) (narrow) %v7717_v35, 8  ;;  %v7909_v27 = vpop.trf.xlu0 }
 0x246   : > { %5675 = vxpose.xlu1.b32.start [1/8] (short) (narrow) %v7741_v14, 8  ;;  %v7900_v36 = vpop.trf.xlu1 }
 0x248   : > { %5644 = vxpose.xlu0.b32.cont [2/8] (short) (narrow) %v7708_v55, 8  ;;  %v7915_v14 = vpop.trf.xlu0 }
 0x24a   : > { %5676 = vxpose.xlu1.b32.cont [2/8] (short) (narrow) %v7732_v23, 8  ;;  %v7906_v56 = vpop.trf.xlu1 }
 0x24c   : > { %5645 = vxpose.xlu0.b32.cont [3/8] (short) (narrow) %v7723_v11, 8  ;;  %v7921_v23 = vpop.trf.xlu0 }
 0x24e   : > { %5677 = vxpose.xlu1.b32.cont [3/8] (short) (narrow) %v7747_v17, 8  ;;  %v7912_v18 = vpop.trf.xlu1 }
 0x250   : > { %5646 = vxpose.xlu0.b32.cont [4/8] (short) (narrow) %v7714_v60, 8  ;;  %v7927_v17 = vpop.trf.xlu0 }
 0x251   : > { %8348 = vst [vmem:[#allocation13_spill] sm:$0xff] %v7927_v17  ;;  %v8351_v17 = vld [vmem:[#allocation15_spill] sm:$0xff] }
 0x252   : > { %5678 = vxpose.xlu1.b32.cont [4/8] (short) (narrow) %v7738_v24, 8  ;;  %v7918_v5 = vpop.trf.xlu1 }
 0x253   : > { %8347 = vst [vmem:[#allocation8_spill] sm:$0xff] %v7918_v5  ;;  %v8350_v5 = vld [vmem:[#allocation10_spill] sm:$0xff] }
 0x254   : > { %5647 = vxpose.xlu0.b32.cont [5/8] (short) (narrow) %v7729_v10, 8  ;;  %v7933_v24 = vpop.trf.xlu0 }
 0x256   : > { %5679 = vxpose.xlu1.b32.cont [5/8] (short) (narrow) %v7753_v7, 8  ;;  %v7924_v35 = vpop.trf.xlu1 }
 0x258   : > { %5648 = vxpose.xlu0.b32.cont [6/8] (short) (narrow) %v7720_v54, 8  ;;  %v7939_v7 = vpop.trf.xlu0 }
 0x25a   : > { %5680 = vxpose.xlu1.b32.cont [6/8] (short) (narrow) %v7744_v34, 8  ;;  %v7930_v55 = vpop.trf.xlu1 }
 0x25c   : > { %5649 = vxpose.xlu0.b32.cont [7/8] (short) (narrow) %v8350_v5, 8  ;;  %v7945_v34 = vpop.trf.xlu0 }
 0x25e   : > { %5681 = vxpose.xlu1.b32.cont [7/8] (short) (narrow) %v7759_v4, 8  ;;  %v7936_v11 = vpop.trf.xlu1 }
 0x260   : > { %5650 = vxpose.xlu0.b32.end [8/8] (short) (narrow) %v8351_v17, 8  ;;  %v7951_v4 = vpop.trf.xlu0 }
 0x262   : > { %5682 = vxpose.xlu1.b32.end [8/8] (short) (narrow) %v7750_v21, 8  ;;  %v7942_v60 = vpop.trf.xlu1 }
 0x263   : > { %8349 = vst [vmem:[#allocation22_spill] sm:$0xff] %v7942_v60  ;;  %v8353_v60 = vld [vmem:[#allocation18_spill] sm:$0xff] }
 0x264   : > { %5707 = vxpose.xlu0.b32.start [1/8] (short) (narrow) %v7765_v13, 8  ;;  %v7957_v21 = vpop.trf.xlu0  ;;  %v8355_v13 = vld [vmem:[#allocation11_spill] sm:$0xff] }
 0x266   : > { %5739 = vxpose.xlu1.b32.start [1/8] (short) (narrow) %v7789_v37, 8  ;;  %v7948_v10 = vpop.trf.xlu1 }
 0x268   : > { %5708 = vxpose.xlu0.b32.cont [2/8] (short) (narrow) %v8353_v60, 8  ;;  %v7963_v37 = vpop.trf.xlu0 }
 0x26a   : > { %5740 = vxpose.xlu1.b32.cont [2/8] (short) (narrow) %v7780_v51, 8  ;;  %v7954_v54 = vpop.trf.xlu1 }
 0x26b   : > { %8352 = vst [vmem:[#allocation20_spill] sm:$0xff] %v7954_v54 }
 0x26c   : > { %5709 = vxpose.xlu0.b32.cont [3/8] (short) (narrow) %v7771_v40, 8  ;;  %v7967_v17 = vpop.trf.xlu0 }
 0x26e   : > { %5741 = vxpose.xlu1.b32.cont [3/8] (short) (narrow) %v7795_v8, 8  ;;  %v7960_v5 = vpop.trf.xlu1 }
 0x270   : > { %5710 = vxpose.xlu0.b32.cont [4/8] (short) (narrow) %v8355_v13, 8  ;;  %v7973_v54 = vpop.trf.xlu0  ;;  %v8356_v13 = vld [vmem:[#allocation14_spill] sm:$0xff] }
 0x272   : > { %5742 = vxpose.xlu1.b32.cont [4/8] (short) (narrow) %v7786_v41, 8  ;;  %v7969_v51 = vpop.trf.xlu1 }
 0x273   : > { %8354 = vst [vmem:[#allocation21_spill] sm:$0xff] %v7969_v51 }
 0x274   : > { %5711 = vxpose.xlu0.b32.cont [5/8] (short) (narrow) %v7777_v22, 8  ;;  %v7979_v41 = vpop.trf.xlu0 }
 0x276   : > { %5743 = vxpose.xlu1.b32.cont [5/8] (short) (narrow) %v7801_v29, 8  ;;  %v7976_v8 = vpop.trf.xlu1 }
 0x278   : > { %5712 = vxpose.xlu0.b32.cont [6/8] (short) (narrow) %v7768_v47, 8  ;;  %v7985_v29 = vpop.trf.xlu0 }
 0x27a   : > { %5744 = vxpose.xlu1.b32.cont [6/8] (short) (narrow) %v7792_v30, 8  ;;  %v7982_v40 = vpop.trf.xlu1 }
 0x27c   : > { %5713 = vxpose.xlu0.b32.cont [7/8] (short) (narrow) %v7783_v20, 8  ;;  %v7991_v30 = vpop.trf.xlu0 }
 0x27e   : > { %5745 = vxpose.xlu1.b32.cont [7/8] (short) (narrow) %v7807_v61, 8  ;;  %v7988_v60 = vpop.trf.xlu1 }
 0x280   : > { %5714 = vxpose.xlu0.b32.end [8/8] (short) (narrow) %v8356_v13, 8  ;;  %v7997_v61 = vpop.trf.xlu0 }
 0x282   : > { %5746 = vxpose.xlu1.b32.end [8/8] (short) (narrow) %v7798_v39, 8  ;;  %v7994_v22 = vpop.trf.xlu1 }
 0x284   : > { %5771 = vxpose.xlu0.b32.start [1/8] (short) (narrow) %v7813_v31, 8  ;;  %v5531_v39 = vpop.trf.xlu0  ;;  %v8357_v31 = vld [vmem:[#allocation22_spill] sm:$0xff] }
 0x286   : > { %5803 = vxpose.xlu1.b32.start [1/8] (short) (narrow) %v7837_v44, 8  ;;  %v5563_v47 = vpop.trf.xlu1  ;;  %v8361_v44 = vld [vmem:[#allocation21_spill] sm:$0xff] }
 0x287   : > { %v6031_v51 = vcombine.low %v5531_v39, %v5563_v47 }
 0x288   : > { %5772 = vxpose.xlu0.b32.cont [2/8] (short) (narrow) %v7804_v58, 8 }
 0x289   : > { %6036 = vst.msk [vmem:[%s8003_s2] sm:$0xff] %vm6035_vm0, %v6031_v51 }
 0x28a   : > { %5804 = vxpose.xlu1.b32.cont [2/8] (short) (narrow) %v7828_v25, 8 }
 0x28c   : > { %5773 = vxpose.xlu0.b32.cont [3/8] (short) (narrow) %v7819_v3, 8  ;;  %v8359_v3 = vld [vmem:[#allocation8_spill] sm:$0xff] }
 0x28e   : > { %5805 = vxpose.xlu1.b32.cont [3/8] (short) (narrow) %v7843_v1, 8 }
 0x290   : > { %5774 = vxpose.xlu0.b32.cont [4/8] (short) (narrow) %v7810_v43, 8 }
 0x292   : > { %5806 = vxpose.xlu1.b32.cont [4/8] (short) (narrow) %v7834_v12, 8 }
 0x294   : > { %5775 = vxpose.xlu0.b32.cont [5/8] (short) (narrow) %v7825_v9, 8 }
 0x296   : > { %5807 = vxpose.xlu1.b32.cont [5/8] (short) (narrow) %v7849_v15, 8 }
 0x298   : > { %5776 = vxpose.xlu0.b32.cont [6/8] (short) (narrow) %v7816_v0, 8  ;;  %v8358_v0 = vld [vmem:[#allocation13_spill] sm:$0xff] }
 0x29a   : > { %5808 = vxpose.xlu1.b32.cont [6/8] (short) (narrow) %v7840_v49, 8 }
 0x29c   : > { %5777 = vxpose.xlu0.b32.cont [7/8] (short) (narrow) %v7831_v2, 8 }
 0x29e   : > { %5809 = vxpose.xlu1.b32.cont [7/8] (short) (narrow) %v7855_v32, 8 }
 0x2a0   : > { %5778 = vxpose.xlu0.b32.end [8/8] (short) (narrow) %v7822_v52, 8  ;;  %v8360_v52 = vld [vmem:[#allocation20_spill] sm:$0xff] }
 0x2a2   : > { %5810 = vxpose.xlu1.b32.end [8/8] (short) (narrow) %v7846_v16, 8 }
 0x2a4   : > { %5835 = vxpose.xlu0.b32.start [1/8] (short) (narrow) %v7861_v59, 8  ;;  %v5595_v58 = vpop.trf.xlu0 }
 0x2a6   : > { %5867 = vxpose.xlu1.b32.start [1/8] (short) (narrow) %v7885_v6, 8  ;;  %v5627_v20 = vpop.trf.xlu1 }
 0x2a7   : > { %v6032_v43 = vcombine.low %v5595_v58, %v5627_v20 }
 0x2a8   : > { %5836 = vxpose.xlu0.b32.cont [2/8] (short) (narrow) %v7852_v33, 8 }
 0x2a9   : > { %6037 = vst.msk [vmem:[%s8003_s2 + $0x10] sm:$0xff] %vm6035_vm0, %v6032_v43 }
 0x2aa   : > { %5868 = vxpose.xlu1.b32.cont [2/8] (short) (narrow) %v7876_v48, 8 }
 0x2ac   : > { %5837 = vxpose.xlu0.b32.cont [3/8] (short) (narrow) %v7867_v45, 8 }
 0x2ae   : > { %5869 = vxpose.xlu1.b32.cont [3/8] (short) (narrow) %v7891_v28, 8 }
 0x2b0   : > { %5838 = vxpose.xlu0.b32.cont [4/8] (short) (narrow) %v7858_v63, 8 }
 0x2b2   : > { %5870 = vxpose.xlu1.b32.cont [4/8] (short) (narrow) %v7882_v38, 8 }
 0x2b4   : > { %5839 = vxpose.xlu0.b32.cont [5/8] (short) (narrow) %v7873_v26, 8 }
 0x2b6   : > { %5871 = vxpose.xlu1.b32.cont [5/8] (short) (narrow) %v7897_v50, 8 }
 0x2b8   : > { %5840 = vxpose.xlu0.b32.cont [6/8] (short) (narrow) %v7864_v19, 8 }
 0x2ba   : > { %5872 = vxpose.xlu1.b32.cont [6/8] (short) (narrow) %v7888_v57, 8 }
 0x2bc   : > { %5841 = vxpose.xlu0.b32.cont [7/8] (short) (narrow) %v7879_v46, 8 }
 0x2be   : > { %5873 = vxpose.xlu1.b32.cont [7/8] (short) (narrow) %v7903_v42, 8 }
 0x2c0   : > { %5842 = vxpose.xlu0.b32.end [8/8] (short) (narrow) %v7870_v53, 8 }
 0x2c2   : > { %5874 = vxpose.xlu1.b32.end [8/8] (short) (narrow) %v7894_v62, 8 }
 0x2c4   : > { %5899 = vxpose.xlu0.b32.start [1/8] (short) (narrow) %v7909_v27, 8  ;;  %v5659_v25 = vpop.trf.xlu0 }
 0x2c6   : > { %5931 = vxpose.xlu1.b32.start [1/8] (short) (narrow) %v7933_v24, 8  ;;  %v5691_v9 = vpop.trf.xlu1 }
 0x2c7   : > { %v6042_v63 = vcombine.low %v5659_v25, %v5691_v9 }
 0x2c8   : > { %5900 = vxpose.xlu0.b32.cont [2/8] (short) (narrow) %v7900_v36, 8 }
 0x2ca   : > { %5932 = vxpose.xlu1.b32.cont [2/8] (short) (narrow) %v7924_v35, 8 }
 0x2cc   : > { %5901 = vxpose.xlu0.b32.cont [3/8] (short) (narrow) %v7915_v14, 8 }
 0x2ce   : > { %5933 = vxpose.xlu1.b32.cont [3/8] (short) (narrow) %v7939_v7, 8 }
 0x2d0   : > { %5902 = vxpose.xlu0.b32.cont [4/8] (short) (narrow) %v7906_v56, 8 }
 0x2d2   : > { %5934 = vxpose.xlu1.b32.cont [4/8] (short) (narrow) %v7930_v55, 8 }
 0x2d4   : > { %5903 = vxpose.xlu0.b32.cont [5/8] (short) (narrow) %v7921_v23, 8 }
 0x2d6   : > { %5935 = vxpose.xlu1.b32.cont [5/8] (short) (narrow) %v7945_v34, 8 }
 0x2d8   : > { %5904 = vxpose.xlu0.b32.cont [6/8] (short) (narrow) %v7912_v18, 8 }
 0x2da   : > { %5936 = vxpose.xlu1.b32.cont [6/8] (short) (narrow) %v7936_v11, 8 }
 0x2dc   : > { %5905 = vxpose.xlu0.b32.cont [7/8] (short) (narrow) %v8358_v0, 8 }
 0x2de   : > { %5937 = vxpose.xlu1.b32.cont [7/8] (short) (narrow) %v7951_v4, 8 }
 0x2e0   : > { %5906 = vxpose.xlu0.b32.end [8/8] (short) (narrow) %v8359_v3, 8 }
 0x2e2   : > { %5938 = vxpose.xlu1.b32.end [8/8] (short) (narrow) %v8357_v31, 8 }
 0x2e4   : > { %5963 = vxpose.xlu0.b32.start [1/8] (short) (narrow) %v7957_v21, 8  ;;  %v5723_v12 = vpop.trf.xlu0 }
 0x2e6   : > { %5995 = vxpose.xlu1.b32.start [1/8] (short) (narrow) %v7979_v41, 8  ;;  %v5755_v2 = vpop.trf.xlu1 }
 0x2e7   : > { %v6043_v15 = vcombine.low %v5723_v12, %v5755_v2 }
 0x2e8   : > { %5964 = vxpose.xlu0.b32.cont [2/8] (short) (narrow) %v7948_v10, 8 }
 0x2ea   : > { %5996 = vxpose.xlu1.b32.cont [2/8] (short) (narrow) %v7976_v8, 8 }
 0x2ec   : > { %5965 = vxpose.xlu0.b32.cont [3/8] (short) (narrow) %v7963_v37, 8 }
 0x2ee   : > { %5997 = vxpose.xlu1.b32.cont [3/8] (short) (narrow) %v7985_v29, 8 }
 0x2f0   : > { %5966 = vxpose.xlu0.b32.cont [4/8] (short) (narrow) %v8360_v52, 8 }
 0x2f2   : > { %5998 = vxpose.xlu1.b32.cont [4/8] (short) (narrow) %v7982_v40, 8 }
 0x2f4   : > { %5967 = vxpose.xlu0.b32.cont [5/8] (short) (narrow) %v7967_v17, 8 }
 0x2f6   : > { %5999 = vxpose.xlu1.b32.cont [5/8] (short) (narrow) %v7991_v30, 8 }
 0x2f8   : > { %5968 = vxpose.xlu0.b32.cont [6/8] (short) (narrow) %v7960_v5, 8 }
 0x2fa   : > { %6000 = vxpose.xlu1.b32.cont [6/8] (short) (narrow) %v7988_v60, 8 }
 0x2fc   : > { %5969 = vxpose.xlu0.b32.cont [7/8] (short) (narrow) %v7973_v54, 8 }
 0x2fe   : > { %6001 = vxpose.xlu1.b32.cont [7/8] (short) (narrow) %v7997_v61, 8 }
 0x300   : > { %5970 = vxpose.xlu0.b32.end [8/8] (short) (narrow) %v8361_v44, 8 }
 0x302   : > { %6002 = vxpose.xlu1.b32.end [8/8] (short) (narrow) %v7994_v22, 8 }
 0x304   : > { %v5787_v1 = vpop.trf.xlu0 }
 0x306   : > { %v5819_v49 = vpop.trf.xlu1 }
 0x307   : > { %v6057_v16 = vcombine.low %v5787_v1, %v5819_v49 }
 0x309   : > { %6061 = vst.msk [vmem:[%s8003_s2 + $0x8] sm:$0xff] %vm6035_vm0, %v6057_v16 }
 0x320   : > { %6046 = vrot.lane.b32.xlu1 %v6043_v15, %s6394_s5 }
 0x324   : > { %v5851_v32 = vpop.trf.xlu0 }
 0x326   : > { %v5883_v33 = vpop.trf.xlu1 }
 0x327   : > { %v6058_v59 = vcombine.low %v5851_v32, %v5883_v33 }
 0x329   : > { %6062 = vst.msk [vmem:[%s8003_s2 + $0x18] sm:$0xff] %vm6035_vm0, %v6058_v59  ;;  %6044 = vrot.lane.b32.xlu0 %v6042_v63, %s6394_s5 }
 0x344   : > { %v5915_v45 = vpop.trf.xlu0 }
 0x346   : > { %v5947_v19 = vpop.trf.xlu1 }
 0x347   : > { %v6067_v53 = vcombine.low %v5915_v45, %v5947_v19 }
 0x349   : > { %6069 = vrot.lane.b32.xlu1 %v6067_v53, %s6394_s5 }
 0x364   : > { %v5979_v48 = vpop.trf.xlu0 }
 0x366   : > { %v6011_v26 = vpop.trf.xlu1 }
 0x367   : > { %v6068_v46 = vcombine.low %v5979_v48, %v6011_v26 }
 0x369   : > { %6071 = vrot.lane.b32.xlu1 %v6068_v46, %s6394_s5 }
 0x392   : > { %v6047_v38 = vpop.permute.xlu1 %6046 }
 0x393   : > { %6052 = vst.msk [vmem:[%s8003_s2 + $0x10] sm:$0xff] %vm6050_vm1, %v6047_v38 }
 0x39b   : > { %v6045_v6 = vpop.permute.xlu0 %6044 }
 0x39c   : > { %6051 = vst.msk [vmem:[%s8003_s2] sm:$0xff] %vm6050_vm1, %v6045_v6 }
 0x3bb   : > { %v6070_v57 = vpop.permute.xlu1 %6069 }
 0x3bc   : > { %6075 = vst.msk [vmem:[%s8003_s2 + $0x8] sm:$0xff] %vm6050_vm1, %v6070_v57 }
 0x3db   : > { %v6072_v28 = vpop.permute.xlu1 %6071 }
 0x3dc   : > { %6076 = vst.msk [vmem:[%s8003_s2 + $0x18] sm:$0xff] %vm6050_vm1, %v6072_v28 }
 0x3dd   : > { %6314 = shalt.err (!%p6311_p5)
}
 0x3de   : > { %s6315_s28 = scalar_lea.hbm %s8081_s17, 512  ;;  %s6319_s27 = scalar_lea.hbm %s8134_s1, 1024 }
 0x3df   : > { %p6316_p4 = scmp.ne.s32.totalorder %s8081_s17, %s6315_s28  ;;  %p6320_p12 = scmp.lt.u32.totalorder %s8081_s17, %s8134_s1 }
 0x3e0   : > { %p6321_p1 = scmp.lt.u32.totalorder %s6319_s27, %s6315_s28  ;;  %p6323_p8 = scmp.lt.u32.totalorder %s6315_s28, %s8081_s17 }
 0x3e1   : > { %p6317_p7 = pnand %p6316_p4, %p8362_p9 }
 0x3e2   : > { %p6322_p3 = por %p6321_p1, %p6320_p12 }
 0x3e3   : > { %p6318_p10 = pneg %p6317_p7 }
 0x3e4   : > { %p6324_p11 = por %p6323_p8, %p6322_p3 }
 0x3e6   : > { %p6325_p0 = pnand %p6324_p11, %p6318_p10 }
 0x3e8   : > { %6328 = shalt.err (!%p6325_p0)
}
 0x3e9   : > { %s6396_s30 = smov 256   ;;  %s6397_s2 = smov 16  }
 0x3ea   : > { %6200 = dma.vmem_to_hbm [thread:$0]  (%p8362_p9), %s8083_s13, 512, %s8081_s17, %s6078_s22, %s6396_s30, %s6396_s30, %s6397_s2  }
 0x3eb PF: > { %s6109_s5 = sand.u32 1, %s6363_s6   ;;  %p8363_p6 = scmp.ne.s32.totalorder %s8189_s21, 0 }
 0x3ec   : > { %p8364_p13 = scmp.ge.s32.totalorder %s6383_s11, 2  ;;  %s6110_s12 = scalar_lea.sflag [#allocation4], %s6109_s5 }
 0x3ee   : > { %p6207_p2 = pnand %p8364_p13, %p8363_p6 }
 0x3f0   : > { %6358 = dma.done.wait (!%p6207_p2), %s6110_s12, 512  }
 0x3f1   : > { %6360 = vsyncadd (!%p6207_p2), %s6110_s12, 4294966784  ;;  %s17_s11 = sadd.s32 1, %s6383_s11   ;;  %s8365_s6 = smov %s6367_s7 }
 0x3f2   : > { %p14_p5 = scmp.ge.s32.totalorder %s17_s11, 4   ;;  %s8366_s7 = smov %s6371_s8 }
 0x3f3   : > { %s8367_s8 = smov %s6464_s20  ;;  %s8368_s9 = smov %s6379_s10 }
 0x3f4   : > { %s8369_s10 = smov %s8371_s14  ;;  %16 = sbr.rel (!%p14_p5) target bundleno = 6 (0x6), region = 69 }
 0x3fb   :  { %6115 = vsyncpa [#allocation3], 1 }
 0x3fc   :  { %6117 = vsyncpa [#allocation3 + $0x1], 1 }
 0x3fd   :  { %6118 = vsyncpa [#allocation4], 1 }
 0x3fe   :  { %6120 = vsyncpa [#allocation4 + $0x1], 1 }

</bundles_post_ra>
